<compile_context>
chip_gen: v7x
topology: tpu7x:2x2x1
jax: 0.10.0
libtpu: 0.0.40
codegen_flags: <defaults>
</compile_context>

<pallas_src>
import jax
import jax.numpy as jnp
from jax.experimental import pallas as pl
from jax.experimental.pallas import tpu as pltpu

N_EMBD = 64
N_HEAD = 8
HEAD_SIZE = N_EMBD // N_HEAD
EPS = 1e-5          # nn.LayerNorm default
NEG_BIG = -1e30     # finite mask bias (no -inf/NaN hazards with padded rows)


def _layernorm(x, gamma, beta):
    mu = jnp.mean(x, axis=-1, keepdims=True)
    var = jnp.mean((x - mu) ** 2, axis=-1, keepdims=True)
    return (x - mu) * jax.lax.rsqrt(var + EPS) * gamma + beta


def block_kernel(x_ref, bias_ref,
                 ln1g_ref, ln1b_ref,
                 a_ref, vw_ref, bproj_ref,
                 ln2g_ref, ln2b_ref,
                 w1_ref, b1_ref, w2_ref, b2_ref,
                 o_ref):
    bb, tp, c = x_ref.shape
    m = bb * tp

    x = x_ref[...].reshape(m, c)                        # (M, C) f32

    # ---- LayerNorm 1 (f32) ----
    xln = _layernorm(x, ln1g_ref[...], ln1b_ref[...])
    xln_bf = xln.astype(jnp.bfloat16)
    xln3 = xln_bf.reshape(bb, tp, c)                    # attention key/value basis

    # ---- head-fused score / value projections (lane-dense, single matmuls) ----
    #   t[:,  hC:(h+1)C] = xln @ (scale * Wq_h Wk_h^T)
    #   vp[:, hC:(h+1)C] = xln @ (Wv_h Wproj_h)
    t = jnp.dot(xln_bf, a_ref[...], preferred_element_type=jnp.float32)    # (M, H*C)
    vp = jnp.dot(xln_bf, vw_ref[...], preferred_element_type=jnp.float32)  # (M, H*C)
    t_bf = t.astype(jnp.bfloat16)
    vp_bf = vp.astype(jnp.bfloat16)

    bias = bias_ref[...]                                # (Tp, Tp) causal+pad, resident

    sa = jnp.zeros((m, c), jnp.float32)
    for h in range(N_HEAD):                             # static unroll; each iter is big
        lo = h * c
        t_h = t_bf[:, lo:lo + c].reshape(bb, tp, c)
        wei = jnp.einsum('bqc,bkc->bqk', t_h, xln3,
                         preferred_element_type=jnp.float32)               # (BB,Tp,Tp)
        wei = wei + bias                                # broadcast over BB
        # softmax in f32 (v5e has no bf16 VPU/EUP); normalization deferred past the
        # AV matmul so the divide hits a (Tp, C) tensor, not (Tp, Tp).
        p = jnp.exp(wei - jnp.max(wei, axis=-1, keepdims=True))
        l = jnp.sum(p, axis=-1, keepdims=True)          # (BB, Tp, 1) f32
        vp_h = vp_bf[:, lo:lo + c].reshape(bb, tp, c)
        o_h = jnp.einsum('bqk,bkc->bqc', p.astype(jnp.bfloat16), vp_h,
                         preferred_element_type=jnp.float32)               # (BB,Tp,C)
        o_h = o_h * pl.reciprocal(l, approx=True)
        sa = sa + o_h.reshape(m, c)
        # TODO(synk): attention-weight dropout (p=0.2) omitted — inference mode.
    sa = sa + bproj_ref[...]
    # TODO(synk): projection dropout omitted — inference mode (identity).

    x1 = x + sa

    # ---- LayerNorm 2 + FeedForward ----
    x2ln = _layernorm(x1, ln2g_ref[...], ln2b_ref[...])
    h1 = jnp.dot(x2ln.astype(jnp.bfloat16), w1_ref[...],
                 preferred_element_type=jnp.float32) + b1_ref[...]
    h1 = jnp.maximum(h1, 0.0)                           # ReLU
    ff = jnp.dot(h1.astype(jnp.bfloat16), w2_ref[...],
                 preferred_element_type=jnp.float32) + b2_ref[...]
    # TODO(synk): FFN dropout omitted — inference mode (identity).

    o_ref[...] = (x1 + ff).reshape(bb, tp, c)


def _ceil_to(x, mult):
    return ((x + mult - 1) // mult) * mult


def _vmem_estimate_bytes(bb, tp):
    c = N_EMBD
    m = bb * tp
    scores = 4 * bb * tp * tp * 4             # a few live (BB, Tp, Tp) f32 temporaries
    proj = 3 * m * N_HEAD * c * 4             # t, vp (f32) + bf16 copies
    io = 4 * bb * tp * c * 4                  # double-buffered x / out blocks
    weights = 2 * c * N_HEAD * c * 2 + tp * tp * 4 + 8 * c * 4 * c
    return scores + proj + io + weights + (2 << 20)


def _pick_bb(batch, tp):
    """Largest batch-pack factor that fits the VMEM budget; keep >= 2 grid steps when
    possible (both v7x TensorCores busy, BlockSpec pipelining has work to hide)."""
    best = 1
    for bb in range(1, min(batch, 8) + 1):
        if batch % bb:
            continue
        if _vmem_estimate_bytes(bb, tp) > (40 << 20):
            continue
        if batch // bb >= 2 or batch == 1:
            best = bb
    return best


def _prep_params(params):
    """Fold the n_embd**-0.5 scale, the Q.K^T product and the head-merge + output
    projection into two lane-dense (C, H*C) bf16 weights (see kernel header)."""
    c, hs = N_EMBD, HEAD_SIZE
    scale = c ** -0.5
    a_blocks, vw_blocks = [], []
    for h in range(N_HEAD):
        sl = slice(h * hs, (h + 1) * hs)
        a_blocks.append(scale * (params["wq"][:, sl] @ params["wk"][:, sl].T))
        vw_blocks.append(params["wv"][:, sl] @ params["wproj"][sl, :])
    a_cat = jnp.concatenate(a_blocks, axis=1).astype(jnp.bfloat16)    # (C, H*C)
    vw_cat = jnp.concatenate(vw_blocks, axis=1).astype(jnp.bfloat16)  # (C, H*C)
    return [
        params["ln1_g"], params["ln1_b"],
        a_cat, vw_cat, params["bproj"],
        params["ln2_g"], params["ln2_b"],
        params["w1"].astype(jnp.bfloat16), params["b1"],
        params["w2"].astype(jnp.bfloat16), params["b2"],
    ]


def transformer_block(x, params):
    """x: (B, T, C) float32. params: dict of f32 weights in (in, out) layout."""
    B, T, C = x.shape
    assert C == N_EMBD

    # adaptive padding: sublane (8) multiples for short sequences, lane-dense (128)
    # multiples once the (T, T) score tensors are big enough to care.
    Tp = _ceil_to(T, 8) if T <= 128 else _ceil_to(T, 128)
    x_pad = x if Tp == T else jnp.pad(x, ((0, 0), (0, Tp - T), (0, 0)))

    # causal + key-padding additive bias, built once and kept VMEM-resident.
    # (T is baked into the bias, so the kernel itself needs no t_actual scalar.)
    row = jnp.arange(Tp)[:, None]
    col = jnp.arange(Tp)[None, :]
    keep = (col <= row) & (col < T)
    bias = jnp.where(keep, 0.0, NEG_BIG).astype(jnp.float32)          # (Tp, Tp)

    param_arrays = _prep_params(params)

    BB = _pick_bb(B, Tp)
    grid = (B // BB,)

    def const_spec(arr):                       # whole 2-D param resident in VMEM
        return pl.BlockSpec(arr.shape, lambda i: (0, 0))

    in_specs = [pl.BlockSpec((BB, Tp, C), lambda i: (i, 0, 0)), const_spec(bias)]
    in_specs += [const_spec(a) for a in param_arrays]
    out_spec = pl.BlockSpec((BB, Tp, C), lambda i: (i, 0, 0))

    # raise the scoped-VMEM limit only when the estimate requires it; cap at 64 MiB so
    # the setting also fits v7x. (Bigger shapes should Q-tile the attention instead.)
    est = _vmem_estimate_bytes(BB, Tp)
    vmem_limit = min(est + (8 << 20), 64 << 20) if est > (24 << 20) else None

    out = pl.pallas_call(
        block_kernel,
        out_shape=jax.ShapeDtypeStruct((B, Tp, C), jnp.float32),
        grid_spec=pltpu.PrefetchScalarGridSpec(
            num_scalar_prefetch=0,
            grid=grid,
            in_specs=in_specs,
            out_specs=out_spec,
        ),
        compiler_params=pltpu.CompilerParams(
            dimension_semantics=("parallel",),
            vmem_limit_bytes=vmem_limit),
    )(x_pad, bias, *param_arrays)

    return out[:, :T, :]


def init_params(key):
    """Deterministic synthetic parameters. Linear weights stored as (in, out) so the
    kernel/reference compute y = x @ W + b (equivalent to PyTorch y = x @ W_pt.T + b).
    Column block [h*hs:(h+1)*hs] of wq/wk/wv (and row block of wproj) belongs to head h."""
    ks = jax.random.split(key, 8)
    std = 0.02
    return {
        "ln1_g": jnp.ones((1, N_EMBD), jnp.float32),
        "ln1_b": jnp.zeros((1, N_EMBD), jnp.float32),
        "wq": std * jax.random.normal(ks[0], (N_EMBD, N_EMBD), jnp.float32),
        "wk": std * jax.random.normal(ks[1], (N_EMBD, N_EMBD), jnp.float32),
        "wv": std * jax.random.normal(ks[2], (N_EMBD, N_EMBD), jnp.float32),
        "wproj": std * jax.random.normal(ks[3], (N_EMBD, N_EMBD), jnp.float32),
        "bproj": jnp.zeros((1, N_EMBD), jnp.float32),
        "ln2_g": jnp.ones((1, N_EMBD), jnp.float32),
        "ln2_b": jnp.zeros((1, N_EMBD), jnp.float32),
        "w1": std * jax.random.normal(ks[4], (N_EMBD, 4 * N_EMBD), jnp.float32),
        "b1": jnp.zeros((1, 4 * N_EMBD), jnp.float32),
        "w2": std * jax.random.normal(ks[5], (4 * N_EMBD, N_EMBD), jnp.float32),
        "b2": jnp.zeros((1, N_EMBD), jnp.float32),
    }


def reference_block(x, p):
    """Pure-JAX f32 reference mirroring the PyTorch module (eval mode)."""
    B, T, C = x.shape

    def ln(v, g, b):
        mu = jnp.mean(v, axis=-1, keepdims=True)
        var = jnp.mean((v - mu) ** 2, axis=-1, keepdims=True)
        return (v - mu) / jnp.sqrt(var + EPS) * g + b

    xln = ln(x, p["ln1_g"][0], p["ln1_b"][0])
    q = xln @ p["wq"]
    k = xln @ p["wk"]
    v = xln @ p["wv"]
    mask = jnp.tril(jnp.ones((T, T), bool))
    outs = []
    for h in range(N_HEAD):
        lo, hi = h * HEAD_SIZE, (h + 1) * HEAD_SIZE
        # NOTE: scale is C**-0.5 with C = n_embd (not head_size) — matches PyTorch Head.
        wei = (q[:, :, lo:hi] @ jnp.swapaxes(k[:, :, lo:hi], -1, -2)) * (C ** -0.5)
        wei = jnp.where(mask, wei, -jnp.inf)
        wei = jax.nn.softmax(wei, axis=-1)
        outs.append(wei @ v[:, :, lo:hi])
    sa = jnp.concatenate(outs, axis=-1) @ p["wproj"] + p["bproj"][0]
    x1 = x + sa
    x2 = ln(x1, p["ln2_g"][0], p["ln2_b"][0])
    ff = jnp.maximum(x2 @ p["w1"] + p["b1"][0], 0.0) @ p["w2"] + p["b2"][0]
    return x1 + ff


if __name__ == "__main__":
    key = jax.random.PRNGKey(0)
    k_x, k_p = jax.random.split(key)

    B, T = 2, 8   # small demo shapes; T <= block_size (500)
    x = jax.random.normal(k_x, (B, T, N_EMBD), jnp.float32)
    params = init_params(k_p)

    out = transformer_block(x, params)
    out = jax.block_until_ready(out)

    ref = reference_block(x, params)
    assert out.shape == (B, T, N_EMBD)
    # Tolerance accounts for bf16 MXU operands (f32 accumulation), the wrapper-side
    # bf16 folding of Wq@Wk^T / Wv@Wproj, and the approx reciprocal.
    assert jnp.allclose(out, ref, atol=2e-2, rtol=2e-2), "mismatch vs reference"

    print("KERNEL_OK")
</pallas_src>

<mosaic_0001>
module attributes {stable_mosaic.version = 11 : i64} {
  func.func @block_kernel(%arg0: i32, %arg1: memref<1x8x64xf32, #tpu.memory_space<vmem>>, %arg2: memref<8x8xf32, #tpu.memory_space<vmem>>, %arg3: memref<1x64xf32, #tpu.memory_space<vmem>>, %arg4: memref<1x64xf32, #tpu.memory_space<vmem>>, %arg5: memref<64x512xbf16, #tpu.memory_space<vmem>>, %arg6: memref<64x512xbf16, #tpu.memory_space<vmem>>, %arg7: memref<1x64xf32, #tpu.memory_space<vmem>>, %arg8: memref<1x64xf32, #tpu.memory_space<vmem>>, %arg9: memref<1x64xf32, #tpu.memory_space<vmem>>, %arg10: memref<64x256xbf16, #tpu.memory_space<vmem>>, %arg11: memref<1x256xf32, #tpu.memory_space<vmem>>, %arg12: memref<256x64xbf16, #tpu.memory_space<vmem>>, %arg13: memref<1x64xf32, #tpu.memory_space<vmem>>, %arg14: memref<1x8x64xf32, #tpu.memory_space<vmem>>) attributes {dimension_semantics = [#tpu.dimension_semantics<parallel>], iteration_bounds = array<i64: 2>, scalar_prefetch = 0 : i64, scratch_operands = 0 : i64, tpu.core_type = #tpu.core_type<tc>, window_params = [{transform_indices = @transform_0, window_bounds = array<i64: 1, 8, 64>}, {pipeline_mode = #tpu.pipeline_mode<synchronous>, transform_indices = @transform_1, window_bounds = array<i64: 8, 8>}, {pipeline_mode = #tpu.pipeline_mode<synchronous>, transform_indices = @transform_2, window_bounds = array<i64: 1, 64>}, {pipeline_mode = #tpu.pipeline_mode<synchronous>, transform_indices = @transform_3, window_bounds = array<i64: 1, 64>}, {pipeline_mode = #tpu.pipeline_mode<synchronous>, transform_indices = @transform_4, window_bounds = array<i64: 64, 512>}, {pipeline_mode = #tpu.pipeline_mode<synchronous>, transform_indices = @transform_5, window_bounds = array<i64: 64, 512>}, {pipeline_mode = #tpu.pipeline_mode<synchronous>, transform_indices = @transform_6, window_bounds = array<i64: 1, 64>}, {pipeline_mode = #tpu.pipeline_mode<synchronous>, transform_indices = @transform_7, window_bounds = array<i64: 1, 64>}, {pipeline_mode = #tpu.pipeline_mode<synchronous>, transform_indices = @transform_8, window_bounds = array<i64: 1, 64>}, {pipeline_mode = #tpu.pipeline_mode<synchronous>, transform_indices = @transform_9, window_bounds = array<i64: 64, 256>}, {pipeline_mode = #tpu.pipeline_mode<synchronous>, transform_indices = @transform_10, window_bounds = array<i64: 1, 256>}, {pipeline_mode = #tpu.pipeline_mode<synchronous>, transform_indices = @transform_11, window_bounds = array<i64: 256, 64>}, {pipeline_mode = #tpu.pipeline_mode<synchronous>, transform_indices = @transform_12, window_bounds = array<i64: 1, 64>}, {transform_indices = @transform_13, window_bounds = array<i64: 1, 8, 64>}]} {
    %c0 = arith.constant 0 : index
    %c0_0 = arith.constant 0 : index
    %c0_1 = arith.constant 0 : index
    %0 = vector.load %arg1[%c0, %c0_0, %c0_1] : memref<1x8x64xf32, #tpu.memory_space<vmem>>, vector<1x8x64xf32>
    %1 = vector.shape_cast %0 : vector<1x8x64xf32> to vector<8x64xf32>
    %c0_2 = arith.constant 0 : index
    %c0_3 = arith.constant 0 : index
    %2 = vector.load %arg3[%c0_2, %c0_3] : memref<1x64xf32, #tpu.memory_space<vmem>>, vector<1x64xf32>
    %c0_4 = arith.constant 0 : index
    %c0_5 = arith.constant 0 : index
    %3 = vector.load %arg4[%c0_4, %c0_5] : memref<1x64xf32, #tpu.memory_space<vmem>>, vector<1x64xf32>
    %cst = arith.constant dense<0.000000e+00> : vector<8xf32>
    %4 = vector.multi_reduction <add>, %1, %cst [1] : vector<8x64xf32> to vector<8xf32>
    %5 = vector.shape_cast %4 : vector<8xf32> to vector<8x1xf32>
    %cst_6 = arith.constant 6.400000e+01 : f32
    %6 = vector.broadcast %cst_6 : f32 to vector<8x1xf32>
    %7 = arith.divf %5, %6 : vector<8x1xf32>
    %8 = vector.broadcast %7 : vector<8x1xf32> to vector<8x64xf32>
    %9 = arith.subf %1, %8 : vector<8x64xf32>
    %10 = arith.mulf %9, %9 : vector<8x64xf32>
    %cst_7 = arith.constant dense<0.000000e+00> : vector<8xf32>
    %11 = vector.multi_reduction <add>, %10, %cst_7 [1] : vector<8x64xf32> to vector<8xf32>
    %12 = vector.shape_cast %11 : vector<8xf32> to vector<8x1xf32>
    %cst_8 = arith.constant 6.400000e+01 : f32
    %13 = vector.broadcast %cst_8 : f32 to vector<8x1xf32>
    %14 = arith.divf %12, %13 : vector<8x1xf32>
    %15 = vector.broadcast %7 : vector<8x1xf32> to vector<8x64xf32>
    %16 = arith.subf %1, %15 : vector<8x64xf32>
    %cst_9 = arith.constant 9.99999974E-6 : f32
    %17 = vector.broadcast %cst_9 : f32 to vector<8x1xf32>
    %18 = arith.addf %14, %17 : vector<8x1xf32>
    %19 = math.rsqrt %18 : vector<8x1xf32>
    %20 = vector.broadcast %19 : vector<8x1xf32> to vector<8x64xf32>
    %21 = arith.mulf %16, %20 : vector<8x64xf32>
    %22 = vector.broadcast %2 : vector<1x64xf32> to vector<8x64xf32>
    %23 = arith.mulf %21, %22 : vector<8x64xf32>
    %24 = vector.broadcast %3 : vector<1x64xf32> to vector<8x64xf32>
    %25 = arith.addf %23, %24 : vector<8x64xf32>
    %26 = arith.truncf %25 : vector<8x64xf32> to vector<8x64xbf16>
    %27 = vector.shape_cast %26 : vector<8x64xbf16> to vector<1x8x64xbf16>
    %c0_10 = arith.constant 0 : index
    %c0_11 = arith.constant 0 : index
    %28 = vector.load %arg5[%c0_10, %c0_11] : memref<64x512xbf16, #tpu.memory_space<vmem>>, vector<64x512xbf16>
    %cst_12 = arith.constant dense<0.000000e+00> : vector<8x512xf32>
    %29 = tpu.matmul %26, %28, %cst_12 {dimension_numbers = #tpu.dot_dimension_numbers<[1], [0], [0], [1], [0, 0, 1, 1], [], []>} : vector<8x64xbf16>, vector<64x512xbf16>, vector<8x512xf32> -> vector<8x512xf32>
    %c0_13 = arith.constant 0 : index
    %c0_14 = arith.constant 0 : index
    %30 = vector.load %arg6[%c0_13, %c0_14] : memref<64x512xbf16, #tpu.memory_space<vmem>>, vector<64x512xbf16>
    %cst_15 = arith.constant dense<0.000000e+00> : vector<8x512xf32>
    %31 = tpu.matmul %26, %30, %cst_15 {dimension_numbers = #tpu.dot_dimension_numbers<[1], [0], [0], [1], [0, 0, 1, 1], [], []>} : vector<8x64xbf16>, vector<64x512xbf16>, vector<8x512xf32> -> vector<8x512xf32>
    %32 = arith.truncf %29 : vector<8x512xf32> to vector<8x512xbf16>
    %33 = arith.truncf %31 : vector<8x512xf32> to vector<8x512xbf16>
    %c0_16 = arith.constant 0 : index
    %c0_17 = arith.constant 0 : index
    %34 = vector.load %arg2[%c0_16, %c0_17] : memref<8x8xf32, #tpu.memory_space<vmem>>, vector<8x8xf32>
    %cst_18 = arith.constant 0.000000e+00 : f32
    %35 = vector.broadcast %cst_18 : f32 to vector<8x64xf32>
    %36 = vector.extract_strided_slice %32 {offsets = [0, 0], sizes = [8, 64], strides = [1, 1]} : vector<8x512xbf16> to vector<8x64xbf16>
    %37 = vector.shape_cast %36 : vector<8x64xbf16> to vector<1x8x64xbf16>
    "tpu.trace_start"() <{level = 10 : i32, message = "bqc,bkc->bqk"}> : () -> ()
    %cst_19 = arith.constant dense<0.000000e+00> : vector<1x8x8xf32>
    %38 = tpu.matmul %37, %27, %cst_19 {dimension_numbers = #tpu.dot_dimension_numbers<[2], [2], [1], [1], [0, 0, 0, 1, 1, 1], [0], [0]>} : vector<1x8x64xbf16>, vector<1x8x64xbf16>, vector<1x8x8xf32> -> vector<1x8x8xf32>
    "tpu.trace_stop"() : () -> ()
    %39 = vector.shape_cast %34 : vector<8x8xf32> to vector<1x8x8xf32>
    %40 = arith.addf %38, %39 : vector<1x8x8xf32>
    %cst_20 = arith.constant dense<0xFF800000> : vector<1x8xf32>
    %41 = vector.multi_reduction <maximumf>, %40, %cst_20 [2] : vector<1x8x8xf32> to vector<1x8xf32>
    %42 = vector.shape_cast %41 : vector<1x8xf32> to vector<1x8x1xf32>
    %43 = vector.broadcast %42 : vector<1x8x1xf32> to vector<1x8x8xf32>
    %44 = arith.subf %40, %43 : vector<1x8x8xf32>
    %45 = math.exp %44 : vector<1x8x8xf32>
    %cst_21 = arith.constant dense<0.000000e+00> : vector<1x8xf32>
    %46 = vector.multi_reduction <add>, %45, %cst_21 [2] : vector<1x8x8xf32> to vector<1x8xf32>
    %47 = vector.shape_cast %46 : vector<1x8xf32> to vector<1x8x1xf32>
    %48 = vector.extract_strided_slice %33 {offsets = [0, 0], sizes = [8, 64], strides = [1, 1]} : vector<8x512xbf16> to vector<8x64xbf16>
    %49 = vector.shape_cast %48 : vector<8x64xbf16> to vector<1x8x64xbf16>
    %50 = arith.truncf %45 : vector<1x8x8xf32> to vector<1x8x8xbf16>
    "tpu.trace_start"() <{level = 10 : i32, message = "bqk,bkc->bqc"}> : () -> ()
    %cst_22 = arith.constant dense<0.000000e+00> : vector<1x8x64xf32>
    %51 = tpu.matmul %50, %49, %cst_22 {dimension_numbers = #tpu.dot_dimension_numbers<[2], [1], [1], [2], [0, 0, 0, 1, 1, 2], [0], [0]>} : vector<1x8x8xbf16>, vector<1x8x64xbf16>, vector<1x8x64xf32> -> vector<1x8x64xf32>
    "tpu.trace_stop"() : () -> ()
    %52 = tpu.reciprocal %47 {approx = true} : vector<1x8x1xf32> -> vector<1x8x1xf32>
    %53 = vector.broadcast %52 : vector<1x8x1xf32> to vector<1x8x64xf32>
    %54 = arith.mulf %51, %53 : vector<1x8x64xf32>
    %55 = vector.shape_cast %54 : vector<1x8x64xf32> to vector<8x64xf32>
    %56 = arith.addf %35, %55 : vector<8x64xf32>
    %57 = vector.extract_strided_slice %32 {offsets = [0, 64], sizes = [8, 64], strides = [1, 1]} : vector<8x512xbf16> to vector<8x64xbf16>
    %58 = vector.shape_cast %57 : vector<8x64xbf16> to vector<1x8x64xbf16>
    "tpu.trace_start"() <{level = 10 : i32, message = "bqc,bkc->bqk"}> : () -> ()
    %cst_23 = arith.constant dense<0.000000e+00> : vector<1x8x8xf32>
    %59 = tpu.matmul %58, %27, %cst_23 {dimension_numbers = #tpu.dot_dimension_numbers<[2], [2], [1], [1], [0, 0, 0, 1, 1, 1], [0], [0]>} : vector<1x8x64xbf16>, vector<1x8x64xbf16>, vector<1x8x8xf32> -> vector<1x8x8xf32>
    "tpu.trace_stop"() : () -> ()
    %60 = vector.shape_cast %34 : vector<8x8xf32> to vector<1x8x8xf32>
    %61 = arith.addf %59, %60 : vector<1x8x8xf32>
    %cst_24 = arith.constant dense<0xFF800000> : vector<1x8xf32>
    %62 = vector.multi_reduction <maximumf>, %61, %cst_24 [2] : vector<1x8x8xf32> to vector<1x8xf32>
    %63 = vector.shape_cast %62 : vector<1x8xf32> to vector<1x8x1xf32>
    %64 = vector.broadcast %63 : vector<1x8x1xf32> to vector<1x8x8xf32>
    %65 = arith.subf %61, %64 : vector<1x8x8xf32>
    %66 = math.exp %65 : vector<1x8x8xf32>
    %cst_25 = arith.constant dense<0.000000e+00> : vector<1x8xf32>
    %67 = vector.multi_reduction <add>, %66, %cst_25 [2] : vector<1x8x8xf32> to vector<1x8xf32>
    %68 = vector.shape_cast %67 : vector<1x8xf32> to vector<1x8x1xf32>
    %69 = vector.extract_strided_slice %33 {offsets = [0, 64], sizes = [8, 64], strides = [1, 1]} : vector<8x512xbf16> to vector<8x64xbf16>
    %70 = vector.shape_cast %69 : vector<8x64xbf16> to vector<1x8x64xbf16>
    %71 = arith.truncf %66 : vector<1x8x8xf32> to vector<1x8x8xbf16>
    "tpu.trace_start"() <{level = 10 : i32, message = "bqk,bkc->bqc"}> : () -> ()
    %cst_26 = arith.constant dense<0.000000e+00> : vector<1x8x64xf32>
    %72 = tpu.matmul %71, %70, %cst_26 {dimension_numbers = #tpu.dot_dimension_numbers<[2], [1], [1], [2], [0, 0, 0, 1, 1, 2], [0], [0]>} : vector<1x8x8xbf16>, vector<1x8x64xbf16>, vector<1x8x64xf32> -> vector<1x8x64xf32>
    "tpu.trace_stop"() : () -> ()
    %73 = tpu.reciprocal %68 {approx = true} : vector<1x8x1xf32> -> vector<1x8x1xf32>
    %74 = vector.broadcast %73 : vector<1x8x1xf32> to vector<1x8x64xf32>
    %75 = arith.mulf %72, %74 : vector<1x8x64xf32>
    %76 = vector.shape_cast %75 : vector<1x8x64xf32> to vector<8x64xf32>
    %77 = arith.addf %56, %76 : vector<8x64xf32>
    %78 = vector.extract_strided_slice %32 {offsets = [0, 128], sizes = [8, 64], strides = [1, 1]} : vector<8x512xbf16> to vector<8x64xbf16>
    %79 = vector.shape_cast %78 : vector<8x64xbf16> to vector<1x8x64xbf16>
    "tpu.trace_start"() <{level = 10 : i32, message = "bqc,bkc->bqk"}> : () -> ()
    %cst_27 = arith.constant dense<0.000000e+00> : vector<1x8x8xf32>
    %80 = tpu.matmul %79, %27, %cst_27 {dimension_numbers = #tpu.dot_dimension_numbers<[2], [2], [1], [1], [0, 0, 0, 1, 1, 1], [0], [0]>} : vector<1x8x64xbf16>, vector<1x8x64xbf16>, vector<1x8x8xf32> -> vector<1x8x8xf32>
    "tpu.trace_stop"() : () -> ()
    %81 = vector.shape_cast %34 : vector<8x8xf32> to vector<1x8x8xf32>
    %82 = arith.addf %80, %81 : vector<1x8x8xf32>
    %cst_28 = arith.constant dense<0xFF800000> : vector<1x8xf32>
    %83 = vector.multi_reduction <maximumf>, %82, %cst_28 [2] : vector<1x8x8xf32> to vector<1x8xf32>
    %84 = vector.shape_cast %83 : vector<1x8xf32> to vector<1x8x1xf32>
    %85 = vector.broadcast %84 : vector<1x8x1xf32> to vector<1x8x8xf32>
    %86 = arith.subf %82, %85 : vector<1x8x8xf32>
    %87 = math.exp %86 : vector<1x8x8xf32>
    %cst_29 = arith.constant dense<0.000000e+00> : vector<1x8xf32>
    %88 = vector.multi_reduction <add>, %87, %cst_29 [2] : vector<1x8x8xf32> to vector<1x8xf32>
    %89 = vector.shape_cast %88 : vector<1x8xf32> to vector<1x8x1xf32>
    %90 = vector.extract_strided_slice %33 {offsets = [0, 128], sizes = [8, 64], strides = [1, 1]} : vector<8x512xbf16> to vector<8x64xbf16>
    %91 = vector.shape_cast %90 : vector<8x64xbf16> to vector<1x8x64xbf16>
    %92 = arith.truncf %87 : vector<1x8x8xf32> to vector<1x8x8xbf16>
    "tpu.trace_start"() <{level = 10 : i32, message = "bqk,bkc->bqc"}> : () -> ()
    %cst_30 = arith.constant dense<0.000000e+00> : vector<1x8x64xf32>
    %93 = tpu.matmul %92, %91, %cst_30 {dimension_numbers = #tpu.dot_dimension_numbers<[2], [1], [1], [2], [0, 0, 0, 1, 1, 2], [0], [0]>} : vector<1x8x8xbf16>, vector<1x8x64xbf16>, vector<1x8x64xf32> -> vector<1x8x64xf32>
    "tpu.trace_stop"() : () -> ()
    %94 = tpu.reciprocal %89 {approx = true} : vector<1x8x1xf32> -> vector<1x8x1xf32>
    %95 = vector.broadcast %94 : vector<1x8x1xf32> to vector<1x8x64xf32>
    %96 = arith.mulf %93, %95 : vector<1x8x64xf32>
    %97 = vector.shape_cast %96 : vector<1x8x64xf32> to vector<8x64xf32>
    %98 = arith.addf %77, %97 : vector<8x64xf32>
    %99 = vector.extract_strided_slice %32 {offsets = [0, 192], sizes = [8, 64], strides = [1, 1]} : vector<8x512xbf16> to vector<8x64xbf16>
    %100 = vector.shape_cast %99 : vector<8x64xbf16> to vector<1x8x64xbf16>
    "tpu.trace_start"() <{level = 10 : i32, message = "bqc,bkc->bqk"}> : () -> ()
    %cst_31 = arith.constant dense<0.000000e+00> : vector<1x8x8xf32>
    %101 = tpu.matmul %100, %27, %cst_31 {dimension_numbers = #tpu.dot_dimension_numbers<[2], [2], [1], [1], [0, 0, 0, 1, 1, 1], [0], [0]>} : vector<1x8x64xbf16>, vector<1x8x64xbf16>, vector<1x8x8xf32> -> vector<1x8x8xf32>
    "tpu.trace_stop"() : () -> ()
    %102 = vector.shape_cast %34 : vector<8x8xf32> to vector<1x8x8xf32>
    %103 = arith.addf %101, %102 : vector<1x8x8xf32>
    %cst_32 = arith.constant dense<0xFF800000> : vector<1x8xf32>
    %104 = vector.multi_reduction <maximumf>, %103, %cst_32 [2] : vector<1x8x8xf32> to vector<1x8xf32>
    %105 = vector.shape_cast %104 : vector<1x8xf32> to vector<1x8x1xf32>
    %106 = vector.broadcast %105 : vector<1x8x1xf32> to vector<1x8x8xf32>
    %107 = arith.subf %103, %106 : vector<1x8x8xf32>
    %108 = math.exp %107 : vector<1x8x8xf32>
    %cst_33 = arith.constant dense<0.000000e+00> : vector<1x8xf32>
    %109 = vector.multi_reduction <add>, %108, %cst_33 [2] : vector<1x8x8xf32> to vector<1x8xf32>
    %110 = vector.shape_cast %109 : vector<1x8xf32> to vector<1x8x1xf32>
    %111 = vector.extract_strided_slice %33 {offsets = [0, 192], sizes = [8, 64], strides = [1, 1]} : vector<8x512xbf16> to vector<8x64xbf16>
    %112 = vector.shape_cast %111 : vector<8x64xbf16> to vector<1x8x64xbf16>
    %113 = arith.truncf %108 : vector<1x8x8xf32> to vector<1x8x8xbf16>
    "tpu.trace_start"() <{level = 10 : i32, message = "bqk,bkc->bqc"}> : () -> ()
    %cst_34 = arith.constant dense<0.000000e+00> : vector<1x8x64xf32>
    %114 = tpu.matmul %113, %112, %cst_34 {dimension_numbers = #tpu.dot_dimension_numbers<[2], [1], [1], [2], [0, 0, 0, 1, 1, 2], [0], [0]>} : vector<1x8x8xbf16>, vector<1x8x64xbf16>, vector<1x8x64xf32> -> vector<1x8x64xf32>
    "tpu.trace_stop"() : () -> ()
    %115 = tpu.reciprocal %110 {approx = true} : vector<1x8x1xf32> -> vector<1x8x1xf32>
    %116 = vector.broadcast %115 : vector<1x8x1xf32> to vector<1x8x64xf32>
    %117 = arith.mulf %114, %116 : vector<1x8x64xf32>
    %118 = vector.shape_cast %117 : vector<1x8x64xf32> to vector<8x64xf32>
    %119 = arith.addf %98, %118 : vector<8x64xf32>
    %120 = vector.extract_strided_slice %32 {offsets = [0, 256], sizes = [8, 64], strides = [1, 1]} : vector<8x512xbf16> to vector<8x64xbf16>
    %121 = vector.shape_cast %120 : vector<8x64xbf16> to vector<1x8x64xbf16>
    "tpu.trace_start"() <{level = 10 : i32, message = "bqc,bkc->bqk"}> : () -> ()
    %cst_35 = arith.constant dense<0.000000e+00> : vector<1x8x8xf32>
    %122 = tpu.matmul %121, %27, %cst_35 {dimension_numbers = #tpu.dot_dimension_numbers<[2], [2], [1], [1], [0, 0, 0, 1, 1, 1], [0], [0]>} : vector<1x8x64xbf16>, vector<1x8x64xbf16>, vector<1x8x8xf32> -> vector<1x8x8xf32>
    "tpu.trace_stop"() : () -> ()
    %123 = vector.shape_cast %34 : vector<8x8xf32> to vector<1x8x8xf32>
    %124 = arith.addf %122, %123 : vector<1x8x8xf32>
    %cst_36 = arith.constant dense<0xFF800000> : vector<1x8xf32>
    %125 = vector.multi_reduction <maximumf>, %124, %cst_36 [2] : vector<1x8x8xf32> to vector<1x8xf32>
    %126 = vector.shape_cast %125 : vector<1x8xf32> to vector<1x8x1xf32>
    %127 = vector.broadcast %126 : vector<1x8x1xf32> to vector<1x8x8xf32>
    %128 = arith.subf %124, %127 : vector<1x8x8xf32>
    %129 = math.exp %128 : vector<1x8x8xf32>
    %cst_37 = arith.constant dense<0.000000e+00> : vector<1x8xf32>
    %130 = vector.multi_reduction <add>, %129, %cst_37 [2] : vector<1x8x8xf32> to vector<1x8xf32>
    %131 = vector.shape_cast %130 : vector<1x8xf32> to vector<1x8x1xf32>
    %132 = vector.extract_strided_slice %33 {offsets = [0, 256], sizes = [8, 64], strides = [1, 1]} : vector<8x512xbf16> to vector<8x64xbf16>
    %133 = vector.shape_cast %132 : vector<8x64xbf16> to vector<1x8x64xbf16>
    %134 = arith.truncf %129 : vector<1x8x8xf32> to vector<1x8x8xbf16>
    "tpu.trace_start"() <{level = 10 : i32, message = "bqk,bkc->bqc"}> : () -> ()
    %cst_38 = arith.constant dense<0.000000e+00> : vector<1x8x64xf32>
    %135 = tpu.matmul %134, %133, %cst_38 {dimension_numbers = #tpu.dot_dimension_numbers<[2], [1], [1], [2], [0, 0, 0, 1, 1, 2], [0], [0]>} : vector<1x8x8xbf16>, vector<1x8x64xbf16>, vector<1x8x64xf32> -> vector<1x8x64xf32>
    "tpu.trace_stop"() : () -> ()
    %136 = tpu.reciprocal %131 {approx = true} : vector<1x8x1xf32> -> vector<1x8x1xf32>
    %137 = vector.broadcast %136 : vector<1x8x1xf32> to vector<1x8x64xf32>
    %138 = arith.mulf %135, %137 : vector<1x8x64xf32>
    %139 = vector.shape_cast %138 : vector<1x8x64xf32> to vector<8x64xf32>
    %140 = arith.addf %119, %139 : vector<8x64xf32>
    %141 = vector.extract_strided_slice %32 {offsets = [0, 320], sizes = [8, 64], strides = [1, 1]} : vector<8x512xbf16> to vector<8x64xbf16>
    %142 = vector.shape_cast %141 : vector<8x64xbf16> to vector<1x8x64xbf16>
    "tpu.trace_start"() <{level = 10 : i32, message = "bqc,bkc->bqk"}> : () -> ()
    %cst_39 = arith.constant dense<0.000000e+00> : vector<1x8x8xf32>
    %143 = tpu.matmul %142, %27, %cst_39 {dimension_numbers = #tpu.dot_dimension_numbers<[2], [2], [1], [1], [0, 0, 0, 1, 1, 1], [0], [0]>} : vector<1x8x64xbf16>, vector<1x8x64xbf16>, vector<1x8x8xf32> -> vector<1x8x8xf32>
    "tpu.trace_stop"() : () -> ()
    %144 = vector.shape_cast %34 : vector<8x8xf32> to vector<1x8x8xf32>
    %145 = arith.addf %143, %144 : vector<1x8x8xf32>
    %cst_40 = arith.constant dense<0xFF800000> : vector<1x8xf32>
    %146 = vector.multi_reduction <maximumf>, %145, %cst_40 [2] : vector<1x8x8xf32> to vector<1x8xf32>
    %147 = vector.shape_cast %146 : vector<1x8xf32> to vector<1x8x1xf32>
    %148 = vector.broadcast %147 : vector<1x8x1xf32> to vector<1x8x8xf32>
    %149 = arith.subf %145, %148 : vector<1x8x8xf32>
    %150 = math.exp %149 : vector<1x8x8xf32>
    %cst_41 = arith.constant dense<0.000000e+00> : vector<1x8xf32>
    %151 = vector.multi_reduction <add>, %150, %cst_41 [2] : vector<1x8x8xf32> to vector<1x8xf32>
    %152 = vector.shape_cast %151 : vector<1x8xf32> to vector<1x8x1xf32>
    %153 = vector.extract_strided_slice %33 {offsets = [0, 320], sizes = [8, 64], strides = [1, 1]} : vector<8x512xbf16> to vector<8x64xbf16>
    %154 = vector.shape_cast %153 : vector<8x64xbf16> to vector<1x8x64xbf16>
    %155 = arith.truncf %150 : vector<1x8x8xf32> to vector<1x8x8xbf16>
    "tpu.trace_start"() <{level = 10 : i32, message = "bqk,bkc->bqc"}> : () -> ()
    %cst_42 = arith.constant dense<0.000000e+00> : vector<1x8x64xf32>
    %156 = tpu.matmul %155, %154, %cst_42 {dimension_numbers = #tpu.dot_dimension_numbers<[2], [1], [1], [2], [0, 0, 0, 1, 1, 2], [0], [0]>} : vector<1x8x8xbf16>, vector<1x8x64xbf16>, vector<1x8x64xf32> -> vector<1x8x64xf32>
    "tpu.trace_stop"() : () -> ()
    %157 = tpu.reciprocal %152 {approx = true} : vector<1x8x1xf32> -> vector<1x8x1xf32>
    %158 = vector.broadcast %157 : vector<1x8x1xf32> to vector<1x8x64xf32>
    %159 = arith.mulf %156, %158 : vector<1x8x64xf32>
    %160 = vector.shape_cast %159 : vector<1x8x64xf32> to vector<8x64xf32>
    %161 = arith.addf %140, %160 : vector<8x64xf32>
    %162 = vector.extract_strided_slice %32 {offsets = [0, 384], sizes = [8, 64], strides = [1, 1]} : vector<8x512xbf16> to vector<8x64xbf16>
    %163 = vector.shape_cast %162 : vector<8x64xbf16> to vector<1x8x64xbf16>
    "tpu.trace_start"() <{level = 10 : i32, message = "bqc,bkc->bqk"}> : () -> ()
    %cst_43 = arith.constant dense<0.000000e+00> : vector<1x8x8xf32>
    %164 = tpu.matmul %163, %27, %cst_43 {dimension_numbers = #tpu.dot_dimension_numbers<[2], [2], [1], [1], [0, 0, 0, 1, 1, 1], [0], [0]>} : vector<1x8x64xbf16>, vector<1x8x64xbf16>, vector<1x8x8xf32> -> vector<1x8x8xf32>
    "tpu.trace_stop"() : () -> ()
    %165 = vector.shape_cast %34 : vector<8x8xf32> to vector<1x8x8xf32>
    %166 = arith.addf %164, %165 : vector<1x8x8xf32>
    %cst_44 = arith.constant dense<0xFF800000> : vector<1x8xf32>
    %167 = vector.multi_reduction <maximumf>, %166, %cst_44 [2] : vector<1x8x8xf32> to vector<1x8xf32>
    %168 = vector.shape_cast %167 : vector<1x8xf32> to vector<1x8x1xf32>
    %169 = vector.broadcast %168 : vector<1x8x1xf32> to vector<1x8x8xf32>
    %170 = arith.subf %166, %169 : vector<1x8x8xf32>
    %171 = math.exp %170 : vector<1x8x8xf32>
    %cst_45 = arith.constant dense<0.000000e+00> : vector<1x8xf32>
    %172 = vector.multi_reduction <add>, %171, %cst_45 [2] : vector<1x8x8xf32> to vector<1x8xf32>
    %173 = vector.shape_cast %172 : vector<1x8xf32> to vector<1x8x1xf32>
    %174 = vector.extract_strided_slice %33 {offsets = [0, 384], sizes = [8, 64], strides = [1, 1]} : vector<8x512xbf16> to vector<8x64xbf16>
    %175 = vector.shape_cast %174 : vector<8x64xbf16> to vector<1x8x64xbf16>
    %176 = arith.truncf %171 : vector<1x8x8xf32> to vector<1x8x8xbf16>
    "tpu.trace_start"() <{level = 10 : i32, message = "bqk,bkc->bqc"}> : () -> ()
    %cst_46 = arith.constant dense<0.000000e+00> : vector<1x8x64xf32>
    %177 = tpu.matmul %176, %175, %cst_46 {dimension_numbers = #tpu.dot_dimension_numbers<[2], [1], [1], [2], [0, 0, 0, 1, 1, 2], [0], [0]>} : vector<1x8x8xbf16>, vector<1x8x64xbf16>, vector<1x8x64xf32> -> vector<1x8x64xf32>
    "tpu.trace_stop"() : () -> ()
    %178 = tpu.reciprocal %173 {approx = true} : vector<1x8x1xf32> -> vector<1x8x1xf32>
    %179 = vector.broadcast %178 : vector<1x8x1xf32> to vector<1x8x64xf32>
    %180 = arith.mulf %177, %179 : vector<1x8x64xf32>
    %181 = vector.shape_cast %180 : vector<1x8x64xf32> to vector<8x64xf32>
    %182 = arith.addf %161, %181 : vector<8x64xf32>
    %183 = vector.extract_strided_slice %32 {offsets = [0, 448], sizes = [8, 64], strides = [1, 1]} : vector<8x512xbf16> to vector<8x64xbf16>
    %184 = vector.shape_cast %183 : vector<8x64xbf16> to vector<1x8x64xbf16>
    "tpu.trace_start"() <{level = 10 : i32, message = "bqc,bkc->bqk"}> : () -> ()
    %cst_47 = arith.constant dense<0.000000e+00> : vector<1x8x8xf32>
    %185 = tpu.matmul %184, %27, %cst_47 {dimension_numbers = #tpu.dot_dimension_numbers<[2], [2], [1], [1], [0, 0, 0, 1, 1, 1], [0], [0]>} : vector<1x8x64xbf16>, vector<1x8x64xbf16>, vector<1x8x8xf32> -> vector<1x8x8xf32>
    "tpu.trace_stop"() : () -> ()
    %186 = vector.shape_cast %34 : vector<8x8xf32> to vector<1x8x8xf32>
    %187 = arith.addf %185, %186 : vector<1x8x8xf32>
    %cst_48 = arith.constant dense<0xFF800000> : vector<1x8xf32>
    %188 = vector.multi_reduction <maximumf>, %187, %cst_48 [2] : vector<1x8x8xf32> to vector<1x8xf32>
    %189 = vector.shape_cast %188 : vector<1x8xf32> to vector<1x8x1xf32>
    %190 = vector.broadcast %189 : vector<1x8x1xf32> to vector<1x8x8xf32>
    %191 = arith.subf %187, %190 : vector<1x8x8xf32>
    %192 = math.exp %191 : vector<1x8x8xf32>
    %cst_49 = arith.constant dense<0.000000e+00> : vector<1x8xf32>
    %193 = vector.multi_reduction <add>, %192, %cst_49 [2] : vector<1x8x8xf32> to vector<1x8xf32>
    %194 = vector.shape_cast %193 : vector<1x8xf32> to vector<1x8x1xf32>
    %195 = vector.extract_strided_slice %33 {offsets = [0, 448], sizes = [8, 64], strides = [1, 1]} : vector<8x512xbf16> to vector<8x64xbf16>
    %196 = vector.shape_cast %195 : vector<8x64xbf16> to vector<1x8x64xbf16>
    %197 = arith.truncf %192 : vector<1x8x8xf32> to vector<1x8x8xbf16>
    "tpu.trace_start"() <{level = 10 : i32, message = "bqk,bkc->bqc"}> : () -> ()
    %cst_50 = arith.constant dense<0.000000e+00> : vector<1x8x64xf32>
    %198 = tpu.matmul %197, %196, %cst_50 {dimension_numbers = #tpu.dot_dimension_numbers<[2], [1], [1], [2], [0, 0, 0, 1, 1, 2], [0], [0]>} : vector<1x8x8xbf16>, vector<1x8x64xbf16>, vector<1x8x64xf32> -> vector<1x8x64xf32>
    "tpu.trace_stop"() : () -> ()
    %199 = tpu.reciprocal %194 {approx = true} : vector<1x8x1xf32> -> vector<1x8x1xf32>
    %200 = vector.broadcast %199 : vector<1x8x1xf32> to vector<1x8x64xf32>
    %201 = arith.mulf %198, %200 : vector<1x8x64xf32>
    %202 = vector.shape_cast %201 : vector<1x8x64xf32> to vector<8x64xf32>
    %203 = arith.addf %182, %202 : vector<8x64xf32>
    %c0_51 = arith.constant 0 : index
    %c0_52 = arith.constant 0 : index
    %204 = vector.load %arg7[%c0_51, %c0_52] : memref<1x64xf32, #tpu.memory_space<vmem>>, vector<1x64xf32>
    %205 = vector.broadcast %204 : vector<1x64xf32> to vector<8x64xf32>
    %206 = arith.addf %203, %205 : vector<8x64xf32>
    %207 = arith.addf %1, %206 : vector<8x64xf32>
    %c0_53 = arith.constant 0 : index
    %c0_54 = arith.constant 0 : index
    %208 = vector.load %arg8[%c0_53, %c0_54] : memref<1x64xf32, #tpu.memory_space<vmem>>, vector<1x64xf32>
    %c0_55 = arith.constant 0 : index
    %c0_56 = arith.constant 0 : index
    %209 = vector.load %arg9[%c0_55, %c0_56] : memref<1x64xf32, #tpu.memory_space<vmem>>, vector<1x64xf32>
    %cst_57 = arith.constant dense<0.000000e+00> : vector<8xf32>
    %210 = vector.multi_reduction <add>, %207, %cst_57 [1] : vector<8x64xf32> to vector<8xf32>
    %211 = vector.shape_cast %210 : vector<8xf32> to vector<8x1xf32>
    %cst_58 = arith.constant 6.400000e+01 : f32
    %212 = vector.broadcast %cst_58 : f32 to vector<8x1xf32>
    %213 = arith.divf %211, %212 : vector<8x1xf32>
    %214 = vector.broadcast %213 : vector<8x1xf32> to vector<8x64xf32>
    %215 = arith.subf %207, %214 : vector<8x64xf32>
    %216 = arith.mulf %215, %215 : vector<8x64xf32>
    %cst_59 = arith.constant dense<0.000000e+00> : vector<8xf32>
    %217 = vector.multi_reduction <add>, %216, %cst_59 [1] : vector<8x64xf32> to vector<8xf32>
    %218 = vector.shape_cast %217 : vector<8xf32> to vector<8x1xf32>
    %cst_60 = arith.constant 6.400000e+01 : f32
    %219 = vector.broadcast %cst_60 : f32 to vector<8x1xf32>
    %220 = arith.divf %218, %219 : vector<8x1xf32>
    %221 = vector.broadcast %213 : vector<8x1xf32> to vector<8x64xf32>
    %222 = arith.subf %207, %221 : vector<8x64xf32>
    %cst_61 = arith.constant 9.99999974E-6 : f32
    %223 = vector.broadcast %cst_61 : f32 to vector<8x1xf32>
    %224 = arith.addf %220, %223 : vector<8x1xf32>
    %225 = math.rsqrt %224 : vector<8x1xf32>
    %226 = vector.broadcast %225 : vector<8x1xf32> to vector<8x64xf32>
    %227 = arith.mulf %222, %226 : vector<8x64xf32>
    %228 = vector.broadcast %208 : vector<1x64xf32> to vector<8x64xf32>
    %229 = arith.mulf %227, %228 : vector<8x64xf32>
    %230 = vector.broadcast %209 : vector<1x64xf32> to vector<8x64xf32>
    %231 = arith.addf %229, %230 : vector<8x64xf32>
    %232 = arith.truncf %231 : vector<8x64xf32> to vector<8x64xbf16>
    %c0_62 = arith.constant 0 : index
    %c0_63 = arith.constant 0 : index
    %233 = vector.load %arg10[%c0_62, %c0_63] : memref<64x256xbf16, #tpu.memory_space<vmem>>, vector<64x256xbf16>
    %cst_64 = arith.constant dense<0.000000e+00> : vector<8x256xf32>
    %234 = tpu.matmul %232, %233, %cst_64 {dimension_numbers = #tpu.dot_dimension_numbers<[1], [0], [0], [1], [0, 0, 1, 1], [], []>} : vector<8x64xbf16>, vector<64x256xbf16>, vector<8x256xf32> -> vector<8x256xf32>
    %c0_65 = arith.constant 0 : index
    %c0_66 = arith.constant 0 : index
    %235 = vector.load %arg11[%c0_65, %c0_66] : memref<1x256xf32, #tpu.memory_space<vmem>>, vector<1x256xf32>
    %236 = vector.broadcast %235 : vector<1x256xf32> to vector<8x256xf32>
    %237 = arith.addf %234, %236 : vector<8x256xf32>
    %cst_67 = arith.constant 0.000000e+00 : f32
    %238 = vector.broadcast %cst_67 : f32 to vector<8x256xf32>
    %239 = arith.maximumf %237, %238 : vector<8x256xf32>
    %240 = arith.truncf %239 : vector<8x256xf32> to vector<8x256xbf16>
    %c0_68 = arith.constant 0 : index
    %c0_69 = arith.constant 0 : index
    %241 = vector.load %arg12[%c0_68, %c0_69] : memref<256x64xbf16, #tpu.memory_space<vmem>>, vector<256x64xbf16>
    %cst_70 = arith.constant dense<0.000000e+00> : vector<8x64xf32>
    %242 = tpu.matmul %240, %241, %cst_70 {dimension_numbers = #tpu.dot_dimension_numbers<[1], [0], [0], [1], [0, 0, 1, 1], [], []>} : vector<8x256xbf16>, vector<256x64xbf16>, vector<8x64xf32> -> vector<8x64xf32>
    %c0_71 = arith.constant 0 : index
    %c0_72 = arith.constant 0 : index
    %243 = vector.load %arg13[%c0_71, %c0_72] : memref<1x64xf32, #tpu.memory_space<vmem>>, vector<1x64xf32>
    %244 = vector.broadcast %243 : vector<1x64xf32> to vector<8x64xf32>
    %245 = arith.addf %242, %244 : vector<8x64xf32>
    %246 = arith.addf %207, %245 : vector<8x64xf32>
    %247 = vector.shape_cast %246 : vector<8x64xf32> to vector<1x8x64xf32>
    %c0_73 = arith.constant 0 : index
    %c0_74 = arith.constant 0 : index
    %c0_75 = arith.constant 0 : index
    %248 = vector.load %arg14[%c0_73, %c0_74, %c0_75] : memref<1x8x64xf32, #tpu.memory_space<vmem>>, vector<1x8x64xf32>
    tpu.vector_store %arg14[%c0_73, %c0_74, %c0_75], %247 {strides = array<i32>} : memref<1x8x64xf32, #tpu.memory_space<vmem>>, vector<1x8x64xf32>,
    return
  }
  func.func @transform_0(%arg0: i32) -> (i32, i32, i32) {
    %c0_i32 = arith.constant 0 : i32
    %c0_i32_0 = arith.constant 0 : i32
    %c0_i32_1 = arith.constant 0 : i32
    return %arg0, %c0_i32, %c0_i32_0 : i32, i32, i32
  }
  func.func @transform_1(%arg0: i32) -> (i32, i32) {
    %c0_i32 = arith.constant 0 : i32
    %c0_i32_0 = arith.constant 0 : i32
    %c0_i32_1 = arith.constant 0 : i32
    return %c0_i32, %c0_i32_0 : i32, i32
  }
  func.func @transform_2(%arg0: i32) -> (i32, i32) {
    %c0_i32 = arith.constant 0 : i32
    %c0_i32_0 = arith.constant 0 : i32
    %c0_i32_1 = arith.constant 0 : i32
    return %c0_i32, %c0_i32_0 : i32, i32
  }
  func.func @transform_3(%arg0: i32) -> (i32, i32) {
    %c0_i32 = arith.constant 0 : i32
    %c0_i32_0 = arith.constant 0 : i32
    %c0_i32_1 = arith.constant 0 : i32
    return %c0_i32, %c0_i32_0 : i32, i32
  }
  func.func @transform_4(%arg0: i32) -> (i32, i32) {
    %c0_i32 = arith.constant 0 : i32
    %c0_i32_0 = arith.constant 0 : i32
    %c0_i32_1 = arith.constant 0 : i32
    return %c0_i32, %c0_i32_0 : i32, i32
  }
  func.func @transform_5(%arg0: i32) -> (i32, i32) {
    %c0_i32 = arith.constant 0 : i32
    %c0_i32_0 = arith.constant 0 : i32
    %c0_i32_1 = arith.constant 0 : i32
    return %c0_i32, %c0_i32_0 : i32, i32
  }
  func.func @transform_6(%arg0: i32) -> (i32, i32) {
    %c0_i32 = arith.constant 0 : i32
    %c0_i32_0 = arith.constant 0 : i32
    %c0_i32_1 = arith.constant 0 : i32
    return %c0_i32, %c0_i32_0 : i32, i32
  }
  func.func @transform_7(%arg0: i32) -> (i32, i32) {
    %c0_i32 = arith.constant 0 : i32
    %c0_i32_0 = arith.constant 0 : i32
    %c0_i32_1 = arith.constant 0 : i32
    return %c0_i32, %c0_i32_0 : i32, i32
  }
  func.func @transform_8(%arg0: i32) -> (i32, i32) {
    %c0_i32 = arith.constant 0 : i32
    %c0_i32_0 = arith.constant 0 : i32
    %c0_i32_1 = arith.constant 0 : i32
    return %c0_i32, %c0_i32_0 : i32, i32
  }
  func.func @transform_9(%arg0: i32) -> (i32, i32) {
    %c0_i32 = arith.constant 0 : i32
    %c0_i32_0 = arith.constant 0 : i32
    %c0_i32_1 = arith.constant 0 : i32
    return %c0_i32, %c0_i32_0 : i32, i32
  }
  func.func @transform_10(%arg0: i32) -> (i32, i32) {
    %c0_i32 = arith.constant 0 : i32
    %c0_i32_0 = arith.constant 0 : i32
    %c0_i32_1 = arith.constant 0 : i32
    return %c0_i32, %c0_i32_0 : i32, i32
  }
  func.func @transform_11(%arg0: i32) -> (i32, i32) {
    %c0_i32 = arith.constant 0 : i32
    %c0_i32_0 = arith.constant 0 : i32
    %c0_i32_1 = arith.constant 0 : i32
    return %c0_i32, %c0_i32_0 : i32, i32
  }
  func.func @transform_12(%arg0: i32) -> (i32, i32) {
    %c0_i32 = arith.constant 0 : i32
    %c0_i32_0 = arith.constant 0 : i32
    %c0_i32_1 = arith.constant 0 : i32
    return %c0_i32, %c0_i32_0 : i32, i32
  }
  func.func @transform_13(%arg0: i32) -> (i32, i32, i32) {
    %c0_i32 = arith.constant 0 : i32
    %c0_i32_0 = arith.constant 0 : i32
    %c0_i32_1 = arith.constant 0 : i32
    return %arg0, %c0_i32, %c0_i32_0 : i32, i32, i32
  }
}

</mosaic_0001>

<bundles_post_ra>
// kernel: tpu_custom_call.1
= control target key start
LH: loop header
LB: loop body
LE: loop exit
PB: predicated region body
PF: predicated region fallthrough
CT: control target
= control target key end

     0   :  { %s3282_s0 = inlined_call_operand.hbm [shape: f32[2,8,64], index: 0, kind: input, shape index: {}]   ;;  %s3283_s1 = inlined_call_operand.vmem [shape: f32[8,8], index: 1, kind: input, shape index: {}]   ;;  %s3284_s2 = inlined_call_operand.vmem [shape: f32[1,64], index: 2, kind: input, shape index: {}]   ;;  %s3285_s3 = inlined_call_operand.vmem [shape: f32[1,64], index: 3, kind: input, shape index: {}]   ;;  %s3286_s4 = inlined_call_operand.vmem [shape: bf16[64,512], index: 4, kind: input, shape index: {}]   ;;  %s3287_s5 = inlined_call_operand.hbm [shape: bf16[64,512], index: 5, kind: input, shape index: {}]   ;;  %s3288_s6 = inlined_call_operand.vmem [shape: f32[1,64], index: 6, kind: input, shape index: {}]   ;;  %s3289_s7 = inlined_call_operand.vmem [shape: f32[1,64], index: 7, kind: input, shape index: {}]   ;;  %s3290_s8 = inlined_call_operand.vmem [shape: f32[1,64], index: 8, kind: input, shape index: {}]   ;;  %s3291_s9 = inlined_call_operand.vmem [shape: bf16[64,256], index: 9, kind: input, shape index: {}]   ;;  %s3292_s10 = inlined_call_operand.vmem [shape: f32[1,256], index: 10, kind: input, shape index: {}]   ;;  %s3293_s11 = inlined_call_operand.vmem [shape: bf16[256,64], index: 11, kind: input, shape index: {}]   ;;  %s3294_s12 = inlined_call_operand.vmem [shape: f32[1,64], index: 12, kind: input, shape index: {}]   ;;  %s3295_s13 = inlined_call_operand.hbm [shape: f32[2,8,64], index: 13, kind: output, shape index: {}]  }
   0x1   :  { %3304 = sst [smem:[#allocation14_spill]] %s3292_s10 }
   0x2   :  { %3305 = sst [smem:[#allocation15_spill]] %s3294_s12 }
   0x3   :  { %3306 = sst [smem:[#allocation16_spill]] %s3295_s13 }
   0x4   :  { %18 = vsyncpa [#allocation3], 0 }
   0x5   :  { %20 = vsyncpa [#allocation3 + $0x1], 0 }
   0x6   :  { %21 = vsyncpa [#allocation6], 0 }
   0x7   :  { %22 = vsyncpa [#allocation4], 0 }
   0x8   :  { %24 = vsyncpa [#allocation4 + $0x1], 0  ;;  %s2764_s25 = smov 0   ;;  %s2766_s26 = smov 0  }
   0x9   :  { %s2768_s27 = smov 0   ;;  %s2770_s28 = smov 0  }
   0xa LB: > { %3307 = sst [smem:[#allocation11_spill]] %s2671_s25  ;;  %s2785_s29 = sadd.s32 4294967295, %s2683_s28   ;;  %s2683_s28 = sphi %s2770_s28, %s3328_s28   ;;  %s2679_s27 = sphi %s2768_s27, %s3331_s27   ;;  %s2675_s26 = sphi %s2766_s26, %s3330_s26   ;;  %s2671_s25 = sphi %s2764_s25, %s3329_s25  }
   0xb   : > { %s2133_s30 = sadd.s32 4294967294, %s2683_s28   ;;  %p50_p0 = scmp.ne.s32.totalorder %s2675_s26, %s2671_s25 }
   0xc   : > { %p3301_p1 = scmp.eq.s32.totalorder %s2785_s29, 0  ;;  %p332_p3 = scmp.eq.s32.totalorder %s2133_s30, 1 }
   0xd   : > { %p2134_p5 = scmp.ge.s32.totalorder %s2683_s28, 1  ;;  %p339_p7 = scmp.lt.s32.totalorder %s2683_s28, 3 }
   0xe   : > { %p2794_p4 = por %p3301_p1, %p50_p0  ;;  %p2799_p6 = por %p332_p3, %p50_p0 }
   0xf   : > { %p2804_p8 = pnand %p2134_p5, %p339_p7  ;;  %s2685_s17 = smov [#allocation5]  }
  0x10   : > { %s3308_s14 = scalar_select %p2794_p4, 1, 0 }
  0x11   : > { %s3309_s15 = scalar_select %p2799_p6, 1, 0 }
  0x12   : > { %s3311_s16 = scalar_select %p2804_p8, 1, 0 }
  0x13   : > { %3310 = sst [smem:[#allocation12_spill]] %s3309_s15  ;;  %s363_s18 = sshll.u32 %s2685_s17, 4  ;;  %s2808_s18 = int_to_ptr.vmem [resolvable:$true] %s363_s18 }
  0x14   : > { %p2388_p9 = pneg %p2804_p8  ;;  %s2820_s20 = sadd.s32 1, %s2683_s28  }
  0x15   : > { %3313 = sst [smem:[#allocation13_spill]] %s2820_s20  ;;  %s37_s21 = sadd.s32 1, %s2679_s27 }
  0x16   : > { %p2815_p11 = pnand %p2388_p9, %p3301_p1  ;;  %s34_s22 = ssub.s32 %s2683_s28, %s2820_s20 }
  0x17   : > { %s2555_s30 = scalar_lea.hbm %s3287_s5, 2048 }
  0x18   : > { %p2556_p12 = scmp.ne.s32.totalorder %s3287_s5, %s2555_s30  ;;  %p2557_p13 = pneg %p2815_p11 }
  0x19   : > { %p2562_p5 = scmp.lt.u32.totalorder %s2555_s30, %s3287_s5 }
  0x1a   : > { %p2558_p0 = pnand %p2557_p13, %p2556_p12 }
  0x1c   : > { %p2559_p3 = pneg %p2558_p0 }
  0x1e   : > { %p2564_p7 = pnand %p2562_p5, %p2559_p3 }
  0x20   : > { %2567 = shalt.err (!%p2564_p7)
}
  0x21   : > { %s2568_s20 = scalar_lea.vmem %s2808_s18, 2048  ;;  %p2576_p2 = scmp.lt.s32.totalorder %s2808_s18, %s2808_s18 }
  0x22   : > { %p2569_p9 = scmp.ne.s32.totalorder %s2808_s18, %s2568_s20  ;;  %p2577_p6 = scmp.lt.s32.totalorder %s2568_s20, %s2568_s20 }
  0x24   : > { %p2571_p10 = pnand %p2569_p9, %p2557_p13  ;;  %p2578_p4 = por %p2577_p6, %p2576_p2 }
  0x26   : > { %p2572_p1 = pneg %p2571_p10 }
  0x28   : > { %p2579_p8 = pnand %p2578_p4, %p2572_p1 }
  0x2a   : > { %2582 = shalt.err (!%p2579_p8)
}
  0x2b   : > { %s2686_s15 = smov 256   ;;  %s2687_s13 = smov 16  }
  0x2c   : > { %2391 = dma.hbm_to_vmem [thread:$0]  (!%p2815_p11), %s3287_s5, 2048, %s2808_s18, [#allocation6], %s2686_s15, %s2686_s15, %s2687_s13  }
  0x2d   : > { %p35_p2 = scmp.eq.s32.totalorder %s34_s22, 0  ;;  %p44_p1 = scmp.ne.s32.totalorder %s2679_s27, %s2675_s26 }
  0x2e   : > { %p45_p4 = scmp.eq.s32.totalorder %s2683_s28, 0  ;;  %p2401_p6 = scmp.lt.s32.totalorder %s2683_s28, 2 }
  0x2f   : > { %s2851_s20 = scalar_select %p35_p2, %s2679_s27, %s37_s21  }
  0x30   : > { %p46_p8 = por %p45_p4, %p44_p1  ;;  %p3314_p10 = scmp.eq.s32.totalorder %s2785_s29, 1 }
  0x31   : > { %s398_s30 = sand.u32 1, %s2679_s27   ;;  %s2138_s17 = sshll.u32 %s2683_s28, 7 }
  0x32   : > { %p2855_p12 = por %p3314_p10, %p44_p1  ;;  %s2137_s12 = sshll.u32 %s398_s30, 3 }
  0x33   : > { %s2864_s25 = scalar_lea.hbm %s3282_s0, %s2138_s17  ;;  %s402_s18 = scalar_lea.vmem [#allocation2], %s2137_s12 }
  0x34   : > { %s409_s21 = sshll.u32 %s402_s18, 4  ;;  %p2866_p11 = pnand %p2401_p6, %p46_p8  ;;  %s2870_s21 = int_to_ptr.vmem [resolvable:$true] %s409_s21 }
  0x35   : > { %s399_s15 = scalar_lea.sflag [#allocation3], %s398_s30  ;;  %s2583_s13 = scalar_lea.hbm %s2864_s25, 128 }
  0x36   : > { %p2584_p13 = scmp.ne.s32.totalorder %s2864_s25, %s2583_s13  ;;  %p2585_p0 = pneg %p2866_p11 }
  0x37   : > { %s2588_s23 = scalar_lea.hbm %s3282_s0, 256  ;;  %p2589_p7 = scmp.lt.u32.totalorder %s2864_s25, %s3282_s0 }
  0x38   : > { %p2586_p3 = pnand %p2585_p0, %p2584_p13  ;;  %p2590_p9 = scmp.lt.u32.totalorder %s2588_s23, %s2583_s13 }
  0x39   : > { %p2592_p1 = scmp.lt.u32.totalorder %s2583_s13, %s2864_s25 }
  0x3a   : > { %p2587_p5 = pneg %p2586_p3  ;;  %p2591_p2 = por %p2590_p9, %p2589_p7 }
  0x3c   : > { %p2593_p4 = por %p2592_p1, %p2591_p2 }
  0x3e   : > { %p2594_p6 = pnand %p2593_p4, %p2587_p5 }
  0x40   : > { %2597 = shalt.err (!%p2594_p6)
}
  0x41   : > { %s2598_s30 = scalar_lea.vmem %s2870_s21, 128  ;;  %s2688_s18 = smov [#allocation2]  }
  0x42   : > { %p2599_p8 = scmp.ne.s32.totalorder %s2870_s21, %s2598_s30  ;;  %s2603_s10 = sshll.u32 %s2688_s18, 4  ;;  %s2604_s10 = int_to_ptr.vmem [resolvable:$false] %s2603_s10 }
  0x43   : > { %s2605_s12 = scalar_lea.vmem %s2604_s10, 256  ;;  %p2606_p3 = scmp.lt.s32.totalorder %s2870_s21, %s2604_s10 }
  0x44   : > { %p2601_p10 = pnand %p2599_p8, %p2585_p0  ;;  %p2607_p7 = scmp.lt.s32.totalorder %s2605_s12, %s2598_s30 }
  0x46   : > { %p2602_p13 = pneg %p2601_p10  ;;  %p2608_p9 = por %p2607_p7, %p2606_p3 }
  0x48   : > { %p2609_p2 = pnand %p2608_p9, %p2602_p13 }
  0x4a   : > { %2612 = shalt.err (!%p2609_p2)
}
  0x4b   : > { %2395 = dma.hbm_to_vmem [thread:$0]  (!%p2866_p11), %s2864_s25, 128, %s2870_s21, %s399_s15  }
  0x4c   : > { %p3317_p5 = scmp.ne.s32.totalorder %s3311_s16, 0 }
  0x4d   : > { %s2900_s13 = sand.u32 (!%p3317_p5), 1, %s2675_s26   ;;  %p3318_p0 = scmp.ne.s32.totalorder (!%p3317_p5), %s3308_s14, 0 }
  0x4e   : > { %418 = sbr.rel (%p3317_p5) target bundleno = 2456 (0x998), region = 72  ;;  %s2140_s23 = sshll.u32 (!%p3317_p5), %s2900_s13, 3 }
  0x4f   : > { %s421_s17 = scalar_lea.sflag (!%p3317_p5), [#allocation3], %s2900_s13  ;;  %s424_s19 = scalar_lea.vmem (!%p3317_p5), [#allocation2], %s2140_s23 }
  0x55   : > { %2658 = dma.done.wait (%p3318_p0), %s421_s17, 128  }
  0x56   : > { %2660 = vsyncadd (%p3318_p0), %s421_s17, 4294967168  ;;  %p3319_p11 = scmp.eq.s32.totalorder %s2785_s29, 0 }
  0x58   : > { %2662 = dma.done.wait (%p3319_p11), [#allocation6], 2048   ;;  %p3320_p1 = pmov %p3319_p11 }
  0x59   : > { %vm475_vm0 = vcmask 523264   ;;  %v2914_v0 = vld [vmem:[%s424_s19] sm:$0xff]  ;;  %v2689_v25 = vmov 0   ;;  %v2690_v50 = vmov 0.0   ;;  %vm2691_vm1 = vmmov 0   ;;  %s2692_s14 = smov 64  }
  0x5a   : > { %2664 = vsyncadd (%p3320_p1), [#allocation6], 4294965248  ;;  %v476_v1 = vsel %vm475_vm0, %v2914_v0, 0.0  ;;  %v2443_v7 = vld [vmem:[%s3286_s4 + $0x4] ss:$16 sps:$4 sm:$0xff]   ;;  %636 = vmatprep.mubr.bf16.mxu0 %v2689_v25  ;;  %677 = vmatprep.mubr.bf16.mxu1 %v2689_v25  ;;  %vm930_vm2 = vcmask 1043456  }
  0x5b   : > { %477 = vadd.xlane.f32.xlu0 %v476_v1  ;;  %v2445_v8 = vld [vmem:[%s3286_s4 + $0xc] ss:$16 sps:$4 sm:$0xff]   ;;  %v2447_v9 = vld [vmem:[%s3286_s4] ss:$16 sps:$4 sm:$0xff]   ;;  %v2448_v10 = vld [vmem:[%s3286_s4 + $0x8] ss:$16 sps:$4 sm:$0xff]   ;;  %604 = vmatprep.subr.bf16.mxu0 %v2443_v7 }
  0x5c   : > { %645 = vmatprep.subr.bf16.mxu1 %v2445_v8  ;;  %605 = vmatpush1.bf16.msra.mxu0 %v2447_v9  ;;  %v2449_v11 = vld [vmem:[%s3286_s4 + $0x24] ss:$16 sps:$4 sm:$0xff]   ;;  %v2451_v12 = vld [vmem:[%s3286_s4 + $0x2c] ss:$16 sps:$4 sm:$0xff]   ;;  %v2453_v13 = vld [vmem:[%s3286_s4 + $0x20] ss:$16 sps:$4 sm:$0xff]  }
  0x5d   : > { %646 = vmatpush1.bf16.msra.mxu1 %v2448_v10  ;;  %v2454_v14 = vld [vmem:[%s3286_s4 + $0x28] ss:$16 sps:$4 sm:$0xff]   ;;  %606 = vmatprep.subr.bf16.mxu0 %v2449_v11  ;;  %v2455_v15 = vld [vmem:[%s3286_s4 + $0x44] ss:$16 sps:$4 sm:$0xff]   ;;  %v2457_v16 = vld [vmem:[%s3286_s4 + $0x4c] ss:$16 sps:$4 sm:$0xff]  }
  0x5e   : > { %647 = vmatprep.subr.bf16.mxu1 %v2451_v12  ;;  %v2459_v17 = vld [vmem:[%s3286_s4 + $0x40] ss:$16 sps:$4 sm:$0xff]   ;;  %v2460_v18 = vld [vmem:[%s3286_s4 + $0x48] ss:$16 sps:$4 sm:$0xff]   ;;  %v2461_v19 = vld [vmem:[%s3286_s4 + $0x64] ss:$16 sps:$4 sm:$0xff]  }
  0x5f   : > { %v2463_v20 = vld [vmem:[%s3286_s4 + $0x6c] ss:$16 sps:$4 sm:$0xff]   ;;  %v2465_v21 = vld [vmem:[%s3286_s4 + $0x60] ss:$16 sps:$4 sm:$0xff]   ;;  %v2466_v22 = vld [vmem:[%s3286_s4 + $0x68] ss:$16 sps:$4 sm:$0xff]  }
  0x60   : > { %607 = vmatpush1.bf16.msra.mxu0 %v2453_v13  ;;  %v2469_v23 = vld [vmem:[#allocation5 + $0x4] ss:$16 sps:$4 sm:$0xff]   ;;  %v2472_v24 = vld [vmem:[#allocation5 + $0xc] ss:$16 sps:$4 sm:$0xff]   ;;  %v2143_v30 = vld [vmem:[%s3284_s2] ss:$0 sm:$0xff] }
  0x61   : > { %648 = vmatpush1.bf16.msra.mxu1 %v2454_v14  ;;  %608 = vmatprep.subr.bf16.mxu0 %v2455_v15  ;;  %v2144_v32 = vld [vmem:[%s3285_s3] ss:$0 sm:$0xff]  ;;  %v2470_v36 = vld [vmem:[#allocation5 + $0x8] ss:$16 sps:$4 sm:$0xff]   ;;  %v2475_v38 = vld [vmem:[#allocation5 + $0x24] ss:$16 sps:$4 sm:$0xff]  }
  0x62   : > { %649 = vmatprep.subr.bf16.mxu1 %v2457_v16  ;;  %v2467_v35 = vld [vmem:[#allocation5] ss:$16 sps:$4 sm:$0xff]   ;;  %v2478_v39 = vld [vmem:[#allocation5 + $0x2c] ss:$16 sps:$4 sm:$0xff]   ;;  %v2476_v41 = vld [vmem:[#allocation5 + $0x28] ss:$16 sps:$4 sm:$0xff]  }
  0x63   : > { %v2473_v40 = vld [vmem:[#allocation5 + $0x20] ss:$16 sps:$4 sm:$0xff]   ;;  %v2481_v42 = vld [vmem:[#allocation5 + $0x44] ss:$16 sps:$4 sm:$0xff]   ;;  %v2484_v43 = vld [vmem:[#allocation5 + $0x4c] ss:$16 sps:$4 sm:$0xff]  }
  0x64   : > { %609 = vmatpush1.bf16.msra.mxu0 %v2459_v17  ;;  %v2479_v44 = vld [vmem:[#allocation5 + $0x40] ss:$16 sps:$4 sm:$0xff]   ;;  %v2482_v45 = vld [vmem:[#allocation5 + $0x48] ss:$16 sps:$4 sm:$0xff]   ;;  %v2487_v46 = vld [vmem:[#allocation5 + $0x64] ss:$16 sps:$4 sm:$0xff]  }
  0x65   : > { %650 = vmatpush1.bf16.msra.mxu1 %v2460_v18  ;;  %610 = vmatprep.subr.bf16.mxu0 %v2461_v19  ;;  %v2490_v47 = vld [vmem:[#allocation5 + $0x6c] ss:$16 sps:$4 sm:$0xff]   ;;  %v2485_v48 = vld [vmem:[#allocation5 + $0x60] ss:$16 sps:$4 sm:$0xff]   ;;  %v2488_v49 = vld [vmem:[#allocation5 + $0x68] ss:$16 sps:$4 sm:$0xff]  }
  0x66   : > { %651 = vmatprep.subr.bf16.mxu1 %v2463_v20  ;;  %v3011_v9 = vld [vmem:[%s3283_s1] sm:$0xff]  ;;  %vm916_vm3 = vcmask 64512   ;;  %s3321_s19 = sld [smem:[#allocation14_spill]]  ;;  %s3322_s25 = sld [smem:[#allocation15_spill]] }
  0x67   : > { %s2227_s21 = sshll.u32 %s2785_s29, 7  ;;  %s470_s22 = scalar_lea.vmem [#allocation7], %s2140_s23 }
  0x68   : > { %611 = vmatpush1.bf16.msra.mxu0 %v2465_v21  ;;  %s2053_s15 = sshll.u32 %s470_s22, 4  ;;  %s3323_s10 = sld [smem:[#allocation16_spill]]  ;;  %s3239_s15 = int_to_ptr.vmem [resolvable:$true] %s2053_s15 }
  0x69   : > { %652 = vmatpush1.bf16.msra.mxu1 %v2466_v22  ;;  %782 = vmatprep.subr.bf16.mxu0 %v2469_v23  ;;  %s2040_s17 = scalar_lea.sflag [#allocation4], %s2900_s13  ;;  %s2613_s29 = scalar_lea.vmem %s3239_s15, 128 }
  0x6a   : > { %823 = vmatprep.subr.bf16.mxu1 %v2472_v24  ;;  %p2614_p4 = scmp.ne.s32.totalorder %s3239_s15, %s2613_s29  ;;  %s2693_s23 = smov [#allocation7]  }
  0x6c   : > { %p2615_p6 = pnand %p2614_p4, %p2855_p12 }
  0x6e   : > { %s3237_s12 = scalar_lea.hbm %s3323_s10, %s2227_s21  ;;  %p2616_p8 = pneg %p2615_p6 }
  0xe8   : > { %v478_v2 = vpop.xlane.xlu0 %477 }
  0xe9   : > { %v480_v3 = vmul.f32 0.015625, %v478_v2 }
  0xeb   : > { %v481_v4 = vsub.f32 %v2914_v0, %v480_v3 }
  0xed   : > { %v482_v5 = vmul.f32 %v481_v4, %v481_v4 }
  0xef   : > { %v483_v6 = vsel %vm475_vm0, %v482_v5, 0.0 }
  0xf0   : > { %484 = vadd.xlane.f32.xlu0 %v483_v6 }
 0x17d   : > { %v485_v26 = vpop.xlane.xlu0 %484 }
 0x17e   : > { %v486_v27 = vmul.f32 0.015625, %v485_v26 }
 0x180   : > { %v487_v28 = vadd.f32 1e-05, %v486_v27 }
 0x182   : > { %2519 = vrsqrt.f32 %v487_v28 }
 0x18c   : > { %v2520_v29 = vpop.eup %2519 }
 0x18d   : > { %v489_v31 = vmul.f32 %v2520_v29, %v481_v4 }
 0x18f   : > { %v496_v33 = vmul.f32 %v2143_v30, %v489_v31 }
 0x191   : > { %v503_v34 = vadd.f32 %v2144_v32, %v496_v33 }
 0x193   : > { %v504_v37 = vpack.c.bf16 %v503_v34, %v503_v34 }
 0x195   : > { %2161 = vmatmul.mubr.msk.bf16.vlgmr.msra.gmra.mrb[0].mxu0 %vm475_vm0, %v504_v37  ;;  %2162 = vmatmul.mubr.msk.bf16.vlgmr.msra.gmra.mrb[0].mxu1 %vm475_vm0, %v504_v37  ;;  %v2985_v51 = vsel %vm475_vm0, %v504_v37, 0 }
 0x196   : > { %783 = vmatpush1.bf16.msra.mxu0 %v2467_v35  ;;  %824 = vmatpush1.bf16.msra.mxu1 %v2470_v36 }
 0x197   : > { %784 = vmatprep.subr.bf16.mxu0 %v2475_v38  ;;  %825 = vmatprep.subr.bf16.mxu1 %v2478_v39 }
 0x198   : > { %814 = vmatprep.mubr.bf16.mxu0 %v2689_v25  ;;  %855 = vmatprep.mubr.bf16.mxu1 %v2689_v25 }
 0x19a   : > { %785 = vmatpush1.bf16.msra.mxu0 %v2473_v40  ;;  %826 = vmatpush1.bf16.msra.mxu1 %v2476_v41 }
 0x19b   : > { %786 = vmatprep.subr.bf16.mxu0 %v2481_v42  ;;  %827 = vmatprep.subr.bf16.mxu1 %v2484_v43 }
 0x19e   : > { %787 = vmatpush1.bf16.msra.mxu0 %v2479_v44  ;;  %828 = vmatpush1.bf16.msra.mxu1 %v2482_v45 }
 0x19f   : > { %788 = vmatprep.subr.bf16.mxu0 %v2487_v46  ;;  %829 = vmatprep.subr.bf16.mxu1 %v2490_v47 }
 0x1a2   : > { %789 = vmatpush1.bf16.msra.mxu0 %v2485_v48  ;;  %830 = vmatpush1.bf16.msra.mxu1 %v2488_v49 }
 0x1a3   : > { %2284 = vmatprep.subr.bf16.mxu0 %v2690_v50  ;;  %2302 = vmatprep.subr.bf16.mxu1 %v2690_v50 }
 0x1a5   : > { %2179 = vmatmul.mubr.msk.bf16.vlgmr.msra.gmra.mrb[4].mxu0 %vm475_vm0, %v504_v37  ;;  %2180 = vmatmul.mubr.msk.bf16.vlgmr.msra.gmra.mrb[4].mxu1 %vm475_vm0, %v504_v37 }
 0x1a6   : > { %2286 = vmatprep.mubr.msk.bf16.mxu0 %vm2691_vm1, %v2690_v50  ;;  %2304 = vmatprep.mubr.msk.bf16.mxu1 %vm2691_vm1, %v2690_v50 }
 0x1ab   : > { %2285 = vmatpush3.bf16.xpose.msra.mxu0 %v2985_v51 }
 0x1ac   : > { %2290 = vmatprep.subr.bf16.mxu0 %v2690_v50 }
 0x268   : > { %v638_v52 = vpop.f32.mrb[0].mxu0  ;;  %v679_v53 = vpop.f32.mrb[0].mxu1 }
 0x269   : > { %v864_v54 = vpack.c.bf16 %v638_v52, %v638_v52  ;;  %v640_v55 = vpop.f32.mrb[1].mxu0  ;;  %v681_v56 = vpop.f32.mrb[1].mxu1  ;;  %v866_v16 = vpack.c.bf16 %v679_v53, %v679_v53 }
 0x26a   : > { %v865_v57 = vpack.c.bf16 %v640_v55, %v640_v55  ;;  %v642_v58 = vpop.f32.mrb[2].mxu0  ;;  %v683_v59 = vpop.f32.mrb[2].mxu1  ;;  %v867_v17 = vpack.c.bf16 %v681_v56, %v681_v56 }
 0x26b   : > { %v643_v60 = vpop.f32.mrb[3].mxu0  ;;  %v684_v61 = vpop.f32.mrb[3].mxu1  ;;  %2287 = vmatmul.mubr.msk.bf16.vlgmr.msra.gmra.mrb[8].mxu0 %vm475_vm0, %v864_v54 }
 0x26c   : > { %1188 = vrot.lane.b32.xlu0 %v865_v57, %s2692_s14  ;;  %2292 = vmatprep.mubr.msk.bf16.mxu0 %vm2691_vm1, %v2690_v50 }
 0x278   : > { %v816_v62 = vpop.f32.mrb[4].mxu0  ;;  %v2997_v63 = vpop.f32.mrb[4].mxu1 }
 0x279   : > { %v2999_v1 = vpack.c.bf16 %v816_v62, %v816_v62  ;;  %v3001_v2 = vpop.f32.mrb[5].mxu0  ;;  %v3003_v3 = vpop.f32.mrb[5].mxu1 }
 0x27a   : > { %v820_v4 = vpop.f32.mrb[6].mxu0  ;;  %v861_v5 = vpop.f32.mrb[6].mxu1  ;;  %v869_v52 = vpack.c.bf16 %v3001_v2, %v3001_v2 }
 0x27b   : > { %v932_v6 = vsel %vm930_vm2, %v2999_v1, 0  ;;  %v821_v7 = vpop.f32.mrb[7].mxu0  ;;  %v862_v8 = vpop.f32.mrb[7].mxu1 }
 0x27c   : > { %2291 = vmatpush3.bf16.msra.mxu0 %v932_v6 }
 0x27d   : > { %2296 = vmatprep.subr.bf16.mxu0 %v2690_v50 }
 0x2de   : > { %v1189_v24 = vpop.permute.xlu0 %1188 }
 0x33e   : > { %v910_v10 = vpop.f32.mrb[8].mxu0 }
 0x33f   : > { %v911_v11 = vadd.f32 %v910_v10, %v3011_v9  ;;  %v2288_v12 = vpop.f32.mrb[9].mxu0 }
 0x340   : > { %v913_v13 = vpop.f32.mrb[10].mxu0 }
 0x341   : > { %v2289_v14 = vpop.f32.mrb[11].mxu0  ;;  %v917_v15 = vsel %vm916_vm3, %v911_v11, -inf }
 0x342   : > { %918 = vmax.xlane.f32.xlu1 %v917_v15  ;;  %v870_v15 = vpack.c.bf16 %v2997_v63, %v2997_v63 }
 0x353   : > { %978 = vrot.lane.b32.xlu1 %v864_v54, %s2692_s14 }
 0x357   : > { %1398 = vrot.lane.b32.xlu1 %v866_v16, %s2692_s14 }
 0x35b   : > { %1608 = vrot.lane.b32.xlu1 %v867_v17, %s2692_s14 }
 0x3cf   : > { %v919_v18 = vpop.xlane.xlu1 %918 }
 0x3d0   : > { %v920_v19 = vsub.f32 %v911_v11, %v919_v18 }
 0x3d2   : > { %v921_v20 = vmul.f32 1.442695, %v920_v19 }
 0x3d3   : > { %v979_v23 = vpop.permute.xlu1 %978 }
 0x3d4   : > { %2521 = vpow2.f32 %v921_v20 }
 0x3d7   : > { %v1399_v26 = vpop.permute.xlu1 %1398 }
 0x3db   : > { %v1609_v27 = vpop.permute.xlu1 %1608 }
 0x3de   : > { %v3018_v21 = vpop.eup %2521 }
 0x3df   : > { %v926_v22 = vpack.c.bf16 %v3018_v21, %v3018_v21 }
 0x3e1   : > { %2293 = vmatmul.mubr.msk.bf16.vlgmr.msra.gmra.mrb[12].mxu0 %vm916_vm3, %v926_v22 }
 0x3e2   : > { %2297 = vmatpush3.bf16.xpose.msra.mxu0 %v2985_v51  ;;  %2298 = vmatprep.mubr.msk.bf16.mxu0 %vm2691_vm1, %v2690_v50 }
 0x3e3   : > { %2308 = vmatprep.subr.bf16.mxu0 %v2690_v50 }
 0x3e9   : > { %2299 = vmatmul.mubr.msk.bf16.vlgmr.msra.gmra.mrb[16].mxu0 %vm475_vm0, %v979_v23 }
 0x3ea   : > { %2309 = vmatpush3.bf16.xpose.msra.mxu0 %v2985_v51  ;;  %2310 = vmatprep.mubr.msk.bf16.mxu0 %vm2691_vm1, %v2690_v50 }
 0x3eb   : > { %2320 = vmatprep.subr.bf16.mxu0 %v2690_v50 }
 0x3f1   : > { %2311 = vmatmul.mubr.msk.bf16.vlgmr.msra.gmra.mrb[20].mxu0 %vm475_vm0, %v865_v57 }
 0x3f2   : > { %2321 = vmatpush3.bf16.xpose.msra.mxu0 %v2985_v51  ;;  %2322 = vmatprep.mubr.msk.bf16.mxu0 %vm2691_vm1, %v2690_v50 }
 0x3f3   : > { %2332 = vmatprep.subr.bf16.mxu0 %v2690_v50 }
 0x3f9   : > { %2323 = vmatmul.mubr.msk.bf16.vlgmr.msra.gmra.mrb[24].mxu0 %vm475_vm0, %v1189_v24 }
 0x3fa   : > { %2333 = vmatpush3.bf16.xpose.msra.mxu0 %v2985_v51  ;;  %2334 = vmatprep.mubr.msk.bf16.mxu0 %vm2691_vm1, %v2690_v50 }
 0x3fb   : > { %2344 = vmatprep.subr.bf16.mxu0 %v2690_v50 }
 0x401   : > { %2335 = vmatmul.mubr.msk.bf16.vlgmr.msra.gmra.mrb[28].mxu0 %vm475_vm0, %v866_v16  ;;  %v3087_v16 = vpack.c.bf16 %v3003_v3, %v3003_v3 }
 0x402   : > { %2345 = vmatpush3.bf16.xpose.msra.mxu0 %v2985_v51  ;;  %2346 = vmatprep.mubr.msk.bf16.mxu0 %vm2691_vm1, %v2690_v50 }
 0x403   : > { %2356 = vmatprep.subr.bf16.mxu0 %v2690_v50 }
 0x409   : > { %2347 = vmatmul.mubr.msk.bf16.vlgmr.msra.gmra.mrb[32].mxu0 %vm475_vm0, %v1399_v26 }
 0x40a   : > { %2357 = vmatpush3.bf16.xpose.msra.mxu0 %v2985_v51  ;;  %2358 = vmatprep.mubr.msk.bf16.mxu0 %vm2691_vm1, %v2690_v50 }
 0x40b   : > { %2368 = vmatprep.subr.bf16.mxu0 %v2690_v50 }
 0x411   : > { %2359 = vmatmul.mubr.msk.bf16.vlgmr.msra.gmra.mrb[36].mxu0 %vm475_vm0, %v867_v17 }
 0x412   : > { %2369 = vmatpush3.bf16.xpose.msra.mxu0 %v2985_v51  ;;  %2370 = vmatprep.mubr.msk.bf16.mxu0 %vm2691_vm1, %v2690_v50 }
 0x419   : > { %2371 = vmatmul.mubr.msk.bf16.vlgmr.msra.gmra.mrb[40].mxu0 %vm475_vm0, %v1609_v27 }
 0x41a   : > { %1849 = vmatprep.mubr.bf16.mxu0 %v2689_v25 }
 0x4b4   : > { %v3058_v28 = vpop.f32.mrb[12].mxu0 }
 0x4b5   : > { %v2294_v29 = vpop.f32.mrb[13].mxu0 }
 0x4b6   : > { %v971_v30 = vpop.f32.mrb[14].mxu0 }
 0x4b7   : > { %v2295_v31 = vpop.f32.mrb[15].mxu0 }
 0x4bc   : > { %v1017_v32 = vpop.f32.mrb[16].mxu0 }
 0x4bd   : > { %v1018_v33 = vadd.f32 %v1017_v32, %v3011_v9  ;;  %v2300_v34 = vpop.f32.mrb[17].mxu0 }
 0x4be   : > { %v1020_v35 = vpop.f32.mrb[18].mxu0 }
 0x4bf   : > { %v2301_v36 = vpop.f32.mrb[19].mxu0  ;;  %v1023_v37 = vsel %vm916_vm3, %v1018_v33, -inf }
 0x4c0   : > { %1024 = vmax.xlane.f32.xlu1 %v1023_v37 }
 0x4c4   : > { %v1122_v38 = vpop.f32.mrb[20].mxu0 }
 0x4c5   : > { %v1123_v39 = vadd.f32 %v1122_v38, %v3011_v9  ;;  %v2312_v40 = vpop.f32.mrb[21].mxu0 }
 0x4c6   : > { %v1125_v41 = vpop.f32.mrb[22].mxu0 }
 0x4c7   : > { %v2313_v25 = vpop.f32.mrb[23].mxu0  ;;  %v1128_v42 = vsel %vm916_vm3, %v1123_v39, -inf }
 0x4c8   : > { %1129 = vmax.xlane.f32.xlu0 %v1128_v42 }
 0x4cc   : > { %v1227_v43 = vpop.f32.mrb[24].mxu0 }
 0x4cd   : > { %v2324_v44 = vpop.f32.mrb[25].mxu0  ;;  %v1228_v6 = vadd.f32 %v1227_v43, %v3011_v9 }
 0x4ce   : > { %v1230_v45 = vpop.f32.mrb[26].mxu0 }
 0x4cf   : > { %v2325_v46 = vpop.f32.mrb[27].mxu0  ;;  %v1233_v8 = vsel %vm916_vm3, %v1228_v6, -inf }
 0x4d1   : > { %1034 = vrot.lane.b32.xlu1 %v2999_v1, %s2692_s14 }
 0x4d4   : > { %v1332_v47 = vpop.f32.mrb[28].mxu0 }
 0x4d5   : > { %v2336_v48 = vpop.f32.mrb[29].mxu0  ;;  %v1333_v7 = vadd.f32 %v1332_v47, %v3011_v9 }
 0x4d6   : > { %v1335_v49 = vpop.f32.mrb[30].mxu0 }
 0x4d7   : > { %v2337_v51 = vpop.f32.mrb[31].mxu0  ;;  %v1338_v11 = vsel %vm916_vm3, %v1333_v7, -inf }
 0x4dc   : > { %v1437_v53 = vpop.f32.mrb[32].mxu0 }
 0x4dd   : > { %v2348_v54 = vpop.f32.mrb[33].mxu0  ;;  %v1438_v10 = vadd.f32 %v1437_v53, %v3011_v9 }
 0x4de   : > { %1244 = vrot.lane.b32.xlu0 %v869_v52, %s2692_s14  ;;  %v1440_v55 = vpop.f32.mrb[34].mxu0 }
 0x4df   : > { %v2349_v56 = vpop.f32.mrb[35].mxu0  ;;  %v1443_v13 = vsel %vm916_vm3, %v1438_v10, -inf }
 0x4e4   : > { %v1542_v57 = vpop.f32.mrb[36].mxu0 }
 0x4e5   : > { %v2360_v58 = vpop.f32.mrb[37].mxu0  ;;  %v1543_v12 = vadd.f32 %v1542_v57, %v3011_v9 }
 0x4e6   : > { %v1545_v59 = vpop.f32.mrb[38].mxu0 }
 0x4e7   : > { %v2361_v60 = vpop.f32.mrb[39].mxu0  ;;  %v1548_v14 = vsel %vm916_vm3, %v1543_v12, -inf }
 0x4ec   : > { %v1647_v61 = vpop.f32.mrb[40].mxu0 }
 0x4ed   : > { %v2372_v62 = vpop.f32.mrb[41].mxu0  ;;  %v3070_v5 = vadd.f32 %v1647_v61, %v3011_v9  ;;  %v923_v9 = vsel %vm916_vm3, %v3018_v21, 0.0  ;;  %v1142_v21 = vsel %vm930_vm2, %v869_v52, 0  ;;  %v1352_v52 = vsel %vm930_vm2, %v870_v15, 0 }
 0x4ee   : > { %v1650_v1 = vpop.f32.mrb[42].mxu0 }
 0x4ef   : > { %v2373_v4 = vpop.f32.mrb[43].mxu0  ;;  %v1653_v2 = vsel %vm916_vm3, %v3070_v5, -inf }
 0x4f5   : > { %1654 = vmax.xlane.f32.xlu1 %v1653_v2 }
 0x4fd   : > { %1234 = vmax.xlane.f32.xlu0 %v1233_v8 }
 0x501   : > { %1339 = vmax.xlane.f32.xlu0 %v1338_v11 }
 0x505   : > { %1444 = vmax.xlane.f32.xlu0 %v1443_v13 }
 0x509   : > { %1549 = vmax.xlane.f32.xlu0 %v1548_v14 }
 0x51f   : > { %1454 = vrot.lane.b32.xlu0 %v870_v15, %s2692_s14 }
 0x523   : > { %1664 = vrot.lane.b32.xlu0 %v3087_v16, %s2692_s14 }
 0x542   : > { %924 = vadd.xlane.f32.xlu0 %v923_v9 }
 0x54d   : > { %v1025_v17 = vpop.xlane.xlu1 %1024 }
 0x54e   : > { %v1026_v18 = vsub.f32 %v1018_v33, %v1025_v17 }
 0x550   : > { %v1027_v19 = vmul.f32 1.442695, %v1026_v18 }
 0x551   : > { %v1035_v20 = vpop.permute.xlu1 %1034 }
 0x552   : > { %2523 = vpow2.f32 %v1027_v19  ;;  %v1040_v63 = vsel %vm930_vm2, %v1035_v20, 0 }
 0x553   : > { %2303 = vmatpush3.bf16.msra.mxu1 %v1040_v63 }
 0x554   : > { %2314 = vmatprep.subr.bf16.mxu1 %v2690_v50 }
 0x555   : > { %v1130_v22 = vpop.xlane.xlu0 %1129 }
 0x556   : > { %v1131_v3 = vsub.f32 %v1123_v39, %v1130_v22 }
 0x558   : > { %v1132_v23 = vmul.f32 1.442695, %v1131_v3 }
 0x559   : > { %v1245_v30 = vpop.permute.xlu0 %1244 }
 0x55a   : > { %2525 = vpow2.f32 %v1132_v23  ;;  %v1250_v33 = vsel %vm930_vm2, %v1245_v30, 0 }
 0x55c   : > { %v2524_v24 = vpop.eup %2523 }
 0x55d   : > { %v1029_v26 = vsel %vm916_vm3, %v2524_v24, 0.0  ;;  %v1032_v27 = vpack.c.bf16 %v2524_v24, %v2524_v24 }
 0x55e   : > { %1030 = vadd.xlane.f32.xlu1 %v1029_v26 }
 0x55f   : > { %2305 = vmatmul.mubr.msk.bf16.vlgmr.msra.gmra.mrb[8].mxu1 %vm916_vm3, %v1032_v27 }
 0x560   : > { %2315 = vmatpush3.bf16.msra.mxu1 %v1142_v21  ;;  %2316 = vmatprep.mubr.msk.bf16.mxu1 %vm2691_vm1, %v2690_v50 }
 0x561   : > { %2326 = vmatprep.subr.bf16.mxu1 %v2690_v50 }
 0x564   : > { %v2526_v29 = vpop.eup %2525 }
 0x565   : > { %v1134_v31 = vsel %vm916_vm3, %v2526_v29, 0.0  ;;  %v1137_v32 = vpack.c.bf16 %v2526_v29, %v2526_v29 }
 0x566   : > { %1135 = vadd.xlane.f32.xlu1 %v1134_v31 }
 0x567   : > { %2317 = vmatmul.mubr.msk.bf16.vlgmr.msra.gmra.mrb[12].mxu1 %vm916_vm3, %v1137_v32 }
 0x568   : > { %2327 = vmatpush3.bf16.msra.mxu1 %v1250_v33  ;;  %2328 = vmatprep.mubr.msk.bf16.mxu1 %vm2691_vm1, %v2690_v50 }
 0x569   : > { %2338 = vmatprep.subr.bf16.mxu1 %v2690_v50 }
 0x582   : > { %v1655_v37 = vpop.xlane.xlu1 %1654 }
 0x583   : > { %v1656_v40 = vsub.f32 %v3070_v5, %v1655_v37  ;;  %v1562_v5 = vsel %vm930_vm2, %v3087_v16, 0 }
 0x585   : > { %v1657_v43 = vmul.f32 1.442695, %v1656_v40 }
 0x58a   : > { %v1235_v34 = vpop.xlane.xlu0 %1234 }
 0x58b   : > { %v1236_v35 = vsub.f32 %v1228_v6, %v1235_v34 }
 0x58d   : > { %v1237_v36 = vmul.f32 1.442695, %v1236_v35 }
 0x58e   : > { %v1340_v38 = vpop.xlane.xlu0 %1339 }
 0x58f   : > { %2527 = vpow2.f32 %v1237_v36  ;;  %v1341_v39 = vsub.f32 %v1333_v7, %v1340_v38 }
 0x591   : > { %v1342_v41 = vmul.f32 1.442695, %v1341_v39 }
 0x592   : > { %v1445_v25 = vpop.xlane.xlu0 %1444 }
 0x593   : > { %2529 = vpow2.f32 %v1342_v41  ;;  %v1446_v42 = vsub.f32 %v1438_v10, %v1445_v25 }
 0x595   : > { %v1447_v44 = vmul.f32 1.442695, %v1446_v42 }
 0x596   : > { %v1550_v45 = vpop.xlane.xlu0 %1549 }
 0x597   : > { %2531 = vpow2.f32 %v1447_v44  ;;  %v1551_v46 = vsub.f32 %v1543_v12, %v1550_v45 }
 0x598   : > { %2533 = vpow2.f32 %v1657_v43 }
 0x599   : > { %v2528_v47 = vpop.eup %2527  ;;  %v1552_v48 = vmul.f32 1.442695, %v1551_v46 }
 0x59a   : > { %v1239_v49 = vsel %vm916_vm3, %v2528_v47, 0.0  ;;  %v1242_v51 = vpack.c.bf16 %v2528_v47, %v2528_v47  ;;  %v1455_v56 = vpop.permute.xlu0 %1454 }
 0x59b   : > { %2535 = vpow2.f32 %v1552_v48  ;;  %1240 = vadd.xlane.f32.xlu1 %v1239_v49  ;;  %v1460_v60 = vsel %vm930_vm2, %v1455_v56, 0 }
 0x59c   : > { %2329 = vmatmul.mubr.msk.bf16.vlgmr.msra.gmra.mrb[16].mxu1 %vm916_vm3, %v1242_v51 }
 0x59d   : > { %v2530_v53 = vpop.eup %2529  ;;  %2339 = vmatpush3.bf16.msra.mxu1 %v1352_v52  ;;  %2340 = vmatprep.mubr.msk.bf16.mxu1 %vm2691_vm1, %v2690_v50 }
 0x59e   : > { %v1344_v54 = vsel %vm916_vm3, %v2530_v53, 0.0  ;;  %2350 = vmatprep.subr.bf16.mxu1 %v2690_v50  ;;  %v1347_v58 = vpack.c.bf16 %v2530_v53, %v2530_v53  ;;  %v1665_v2 = vpop.permute.xlu0 %1664 }
 0x59f   : > { %1345 = vadd.xlane.f32.xlu1 %v1344_v54  ;;  %v1670_v7 = vsel %vm930_vm2, %v1665_v2, 0 }
 0x5a1   : > { %v2532_v55 = vpop.eup %2531 }
 0x5a2   : > { %v1449_v57 = vsel %vm916_vm3, %v2532_v55, 0.0  ;;  %v2534_v59 = vpop.eup %2533  ;;  %v1452_v4 = vpack.c.bf16 %v2532_v55, %v2532_v55 }
 0x5a3   : > { %1450 = vadd.xlane.f32.xlu1 %v1449_v57  ;;  %v1659_v1 = vsel %vm916_vm3, %v2534_v59, 0.0  ;;  %v1662_v8 = vpack.c.bf16 %v2534_v59, %v2534_v59 }
 0x5a4   : > { %2341 = vmatmul.mubr.msk.bf16.vlgmr.msra.gmra.mrb[20].mxu1 %vm916_vm3, %v1347_v58 }
 0x5a5   : > { %v2536_v61 = vpop.eup %2535  ;;  %2351 = vmatpush3.bf16.msra.mxu1 %v1460_v60  ;;  %2352 = vmatprep.mubr.msk.bf16.mxu1 %vm2691_vm1, %v2690_v50 }
 0x5a6   : > { %v1554_v62 = vsel %vm916_vm3, %v2536_v61, 0.0  ;;  %2362 = vmatprep.subr.bf16.mxu1 %v2690_v50  ;;  %v1557_v6 = vpack.c.bf16 %v2536_v61, %v2536_v61 }
 0x5a7   : > { %1555 = vadd.xlane.f32.xlu0 %v1554_v62  ;;  %1660 = vadd.xlane.f32.xlu1 %v1659_v1  ;;  %v2197_v1 = vld [vmem:[%s3288_s6] ss:$0 sm:$0xff] }
 0x5ac   : > { %2353 = vmatmul.mubr.msk.bf16.vlgmr.msra.gmra.mrb[24].mxu1 %vm916_vm3, %v1452_v4 }
 0x5ad   : > { %2363 = vmatpush3.bf16.msra.mxu1 %v1562_v5  ;;  %2364 = vmatprep.mubr.msk.bf16.mxu1 %vm2691_vm1, %v2690_v50 }
 0x5ae   : > { %2374 = vmatprep.subr.bf16.mxu1 %v2690_v50 }
 0x5b4   : > { %2365 = vmatmul.mubr.msk.bf16.vlgmr.msra.gmra.mrb[28].mxu1 %vm916_vm3, %v1557_v6 }
 0x5b5   : > { %2375 = vmatpush3.bf16.msra.mxu1 %v1670_v7  ;;  %2376 = vmatprep.mubr.msk.bf16.mxu1 %vm2691_vm1, %v2690_v50 }
 0x5bc   : > { %2377 = vmatmul.mubr.msk.bf16.vlgmr.msra.gmra.mrb[32].mxu1 %vm916_vm3, %v1662_v8 }
 0x5cf   : > { %v925_v10 = vpop.xlane.xlu0 %924 }
 0x5d0   : > { %2537 = vrcp.f32 %v925_v10 }
 0x5da   : > { %v2538_v13 = vpop.eup %2537 }
 0x5db   : > { %v975_v16 = vmul.f32 %v2538_v13, %v3058_v28 }
 0x5eb   : > { %v1031_v11 = vpop.xlane.xlu1 %1030 }
 0x5ec   : > { %2539 = vrcp.f32 %v1031_v11 }
 0x5f3   : > { %v1136_v12 = vpop.xlane.xlu1 %1135 }
 0x5f4   : > { %2541 = vrcp.f32 %v1136_v12 }
 0x5f6   : > { %v2540_v14 = vpop.eup %2539 }
 0x5fe   : > { %v2542_v50 = vpop.eup %2541 }
 0x628   : > { %v1241_v27 = vpop.xlane.xlu1 %1240 }
 0x629   : > { %2543 = vrcp.f32 %v1241_v27  ;;  %v2510_v27 = vld [vmem:[%s3293_s11 + $0x18] sm:$0xff]  }
 0x62c   : > { %v1346_v21 = vpop.xlane.xlu1 %1345 }
 0x62d   : > { %2545 = vrcp.f32 %v1346_v21  ;;  %v2511_v21 = vld [vmem:[%s3293_s11 + $0x60] sm:$0xff]  }
 0x630   : > { %v1451_v33 = vpop.xlane.xlu1 %1450 }
 0x631   : > { %2547 = vrcp.f32 %v1451_v33 }
 0x632   : > { %v1076_v15 = vpop.f32.mrb[8].mxu1 }
 0x633   : > { %v1083_v9 = vmul.f32 %v2540_v14, %v1076_v15  ;;  %v2306_v17 = vpop.f32.mrb[9].mxu1  ;;  %v2544_v29 = vpop.eup %2543  ;;  %v2493_v15 = vld [vmem:[%s3291_s9 + $0x4] ss:$8 sps:$4 sm:$0xff]  }
 0x634   : > { %v1079_v18 = vpop.f32.mrb[10].mxu1  ;;  %v1556_v41 = vpop.xlane.xlu0 %1555  ;;  %1817 = vmatprep.subr.bf16.mxu0 %v2493_v15  ;;  %v2499_v17 = vld [vmem:[%s3291_s9 + $0x24] ss:$8 sps:$4 sm:$0xff]  }
 0x635   : > { %v1084_v19 = vadd.f32 %v1083_v9, %v975_v16  ;;  %v2307_v20 = vpop.f32.mrb[11].mxu1  ;;  %2549 = vrcp.f32 %v1556_v41  ;;  %v1661_v48 = vpop.xlane.xlu1 %1660  ;;  %v2496_v16 = vld [vmem:[%s3291_s9 + $0x14] ss:$8 sps:$4 sm:$0xff]   ;;  %v2494_v9 = vld [vmem:[%s3291_s9 + $0x10] ss:$8 sps:$4 sm:$0xff]  }
 0x636   : > { %2551 = vrcp.f32 %v1661_v48  ;;  %v2497_v18 = vld [vmem:[%s3291_s9 + $0x20] ss:$8 sps:$4 sm:$0xff]   ;;  %v2502_v20 = vld [vmem:[%s3291_s9 + $0x34] ss:$8 sps:$4 sm:$0xff]  }
 0x637   : > { %v2546_v36 = vpop.eup %2545  ;;  %v2515_v41 = vld [vmem:[%s3293_s11 + $0x70] sm:$0xff]  }
 0x63a   : > { %v1178_v63 = vpop.f32.mrb[12].mxu1 }
 0x63b   : > { %v1185_v22 = vmul.f32 %v2542_v50, %v1178_v63  ;;  %v2318_v3 = vpop.f32.mrb[13].mxu1  ;;  %v2548_v43 = vpop.eup %2547  ;;  %v2503_v50 = vld [vmem:[%s3293_s11 + $0x40] sm:$0xff]  }
 0x63c   : > { %v1181_v23 = vpop.f32.mrb[14].mxu1  ;;  %v2504_v63 = vld [vmem:[%s3293_s11] sm:$0xff]   ;;  %2262 = vmatprep.subr.bf16.mxu1 %v2503_v50  ;;  %v2506_v3 = vld [vmem:[%s3293_s11 + $0x8] sm:$0xff]  }
 0x63d   : > { %v1186_v24 = vadd.f32 %v1185_v22, %v1084_v19  ;;  %v2319_v26 = vpop.f32.mrb[15].mxu1  ;;  %v2500_v19 = vld [vmem:[%s3291_s9 + $0x30] ss:$8 sps:$4 sm:$0xff]   ;;  %v2505_v22 = vld [vmem:[%s3293_s11 + $0x48] sm:$0xff]   ;;  %2263 = vmatpush3.bf16.msra.mxu1 %v2504_v63 }
 0x63e   : > { %2264 = vmatprep.subr.bf16.mxu1 %v2505_v22  ;;  %v2507_v23 = vld [vmem:[%s3293_s11 + $0x50] sm:$0xff]   ;;  %v2509_v26 = vld [vmem:[%s3293_s11 + $0x58] sm:$0xff]  }
 0x63f   : > { %v2550_v52 = vpop.eup %2549 }
 0x640   : > { %v2552_v59 = vpop.eup %2551 }
 0x641   : > { %2265 = vmatpush3.bf16.msra.mxu1 %v2506_v3 }
 0x642   : > { %2266 = vmatprep.subr.bf16.mxu1 %v2507_v23 }
 0x66f   : > { %v1286_v30 = vpop.f32.mrb[16].mxu1 }
 0x670   : > { %v1293_v31 = vmul.f32 %v2544_v29, %v1286_v30  ;;  %v2330_v28 = vpop.f32.mrb[17].mxu1  ;;  %v2512_v29 = vld [vmem:[%s3293_s11 + $0x20] sm:$0xff]   ;;  %v2513_v30 = vld [vmem:[%s3293_s11 + $0x68] sm:$0xff]  }
 0x671   : > { %v1289_v32 = vpop.f32.mrb[18].mxu1 }
 0x672   : > { %v1294_v34 = vadd.f32 %v1293_v31, %v1186_v24  ;;  %v2331_v35 = vpop.f32.mrb[19].mxu1  ;;  %v2508_v24 = vld [vmem:[%s3293_s11 + $0x10] sm:$0xff]   ;;  %v2514_v31 = vld [vmem:[%s3293_s11 + $0x28] sm:$0xff]  }
 0x673   : > { %2267 = vmatpush3.bf16.msra.mxu1 %v2508_v24  ;;  %v2198_v35 = vld [vmem:[%s3289_s7] ss:$0 sm:$0xff] }
 0x674   : > { %2268 = vmatprep.subr.bf16.mxu1 %v2509_v26 }
 0x677   : > { %v1388_v37 = vpop.f32.mrb[20].mxu1  ;;  %2269 = vmatpush3.bf16.msra.mxu1 %v2510_v27 }
 0x678   : > { %v1395_v38 = vmul.f32 %v2546_v36, %v1388_v37  ;;  %v2342_v39 = vpop.f32.mrb[21].mxu1  ;;  %2270 = vmatprep.subr.bf16.mxu1 %v2511_v21  ;;  %v2199_v37 = vld [vmem:[%s3290_s8] ss:$0 sm:$0xff] }
 0x679   : > { %v1391_v40 = vpop.f32.mrb[22].mxu1 }
 0x67a   : > { %v1396_v25 = vadd.f32 %v1395_v38, %v1294_v34  ;;  %v2343_v42 = vpop.f32.mrb[23].mxu1 }
 0x67b   : > { %2271 = vmatpush3.bf16.msra.mxu1 %v2512_v29  ;;  %v2517_v42 = vld [vmem:[%s3293_s11 + $0x78] sm:$0xff]  }
 0x67c   : > { %2272 = vmatprep.subr.bf16.mxu1 %v2513_v30 }
 0x67f   : > { %v1496_v44 = vpop.f32.mrb[24].mxu1  ;;  %2273 = vmatpush3.bf16.msra.mxu1 %v2514_v31 }
 0x680   : > { %v1503_v45 = vmul.f32 %v2548_v43, %v1496_v44  ;;  %v2354_v46 = vpop.f32.mrb[25].mxu1  ;;  %2274 = vmatprep.subr.bf16.mxu1 %v2515_v41  ;;  %v2518_v43 = vld [vmem:[%s3293_s11 + $0x38] sm:$0xff]   ;;  %v1764_v44 = vlaneseq }
 0x681   : > { %v1499_v47 = vpop.f32.mrb[26].mxu1 }
 0x682   : > { %v1504_v49 = vadd.f32 %v1503_v45, %v1396_v25  ;;  %v2355_v51 = vpop.f32.mrb[27].mxu1  ;;  %v2516_v25 = vld [vmem:[%s3293_s11 + $0x30] sm:$0xff]   ;;  %v1765_v45 = vshrl.u32 %v1764_v44, 7  ;;  %v1762_v47 = vld [vmem:[%s3321_s19] sm:$0x3]  ;;  %s2617_s19 = sshll.u32 %s2693_s23, 4  ;;  %s2618_s19 = int_to_ptr.vmem [resolvable:$false] %s2617_s19 }
 0x683   : > { %2275 = vmatpush3.bf16.msra.mxu1 %v2516_v25  ;;  %s2619_s14 = scalar_lea.vmem %s2618_s19, 256  ;;  %p2620_p10 = scmp.lt.s32.totalorder %s3239_s15, %s2618_s19 }
 0x684   : > { %2276 = vmatprep.subr.bf16.mxu1 %v2517_v42  ;;  %v1766_v46 = vsub.s32 0, %v1765_v45  ;;  %v1770_v48 = vsub.s32 1, %v1765_v45  ;;  %p2621_p13 = scmp.lt.s32.totalorder %s2619_s14, %s2613_s29 }
 0x686   : > { %v1771_v51 = vrot.slane %v1762_v47, %v1770_v48  ;;  %p2622_p3 = por %p2621_p13, %p2620_p10 }
 0x687   : > { %v1598_v53 = vpop.f32.mrb[28].mxu1  ;;  %2277 = vmatpush3.bf16.msra.mxu1 %v2518_v43 }
 0x688   : > { %v1605_v54 = vmul.f32 %v2550_v52, %v1598_v53  ;;  %v2366_v55 = vpop.f32.mrb[29].mxu1  ;;  %p2623_p7 = pnand %p2622_p3, %p2616_p8 }
 0x689   : > { %v1601_v56 = vpop.f32.mrb[30].mxu1 }
 0x68a   : > { %v1606_v57 = vadd.f32 %v1605_v54, %v1504_v49  ;;  %v2367_v58 = vpop.f32.mrb[31].mxu1  ;;  %v1767_v49 = vrot.slane %v1762_v47, %v1766_v46 }
 0x68f   : > { %v1706_v60 = vpop.f32.mrb[32].mxu1 }
 0x690   : > { %v1713_v61 = vmul.f32 %v2552_v59, %v1706_v60  ;;  %v2378_v62 = vpop.f32.mrb[33].mxu1 }
 0x691   : > { %v1709_v4 = vpop.f32.mrb[34].mxu1 }
 0x692   : > { %v1714_v5 = vadd.f32 %v1713_v61, %v1606_v57  ;;  %v2379_v2 = vpop.f32.mrb[35].mxu1 }
 0x694   : > { %v1722_v6 = vadd.f32 %v2197_v1, %v1714_v5  ;;  %v2209_v1 = vld [vmem:[%s3322_s25] ss:$0 sm:$0xff] }
 0x696   : > { %v3139_v7 = vadd.f32 %v1722_v6, %v2914_v0  ;;  %v2491_v0 = vld [vmem:[%s3291_s9] ss:$8 sps:$4 sm:$0xff]  }
 0x697   : > { %1818 = vmatpush1.bf16.msra.mxu0 %v2491_v0 }
 0x698   : > { %v1726_v8 = vsel %vm475_vm0, %v3139_v7, 0.0  ;;  %1819 = vmatprep.subr.bf16.mxu0 %v2496_v16 }
 0x699   : > { %1727 = vadd.xlane.f32.xlu0 %v1726_v8 }
 0x69b   : > { %1820 = vmatpush1.bf16.msra.mxu0 %v2494_v9 }
 0x69c   : > { %1821 = vmatprep.subr.bf16.mxu0 %v2499_v17 }
 0x69f   : > { %1822 = vmatpush1.bf16.msra.mxu0 %v2497_v18 }
 0x6a0   : > { %1823 = vmatprep.subr.bf16.mxu0 %v2502_v20 }
 0x6a3   : > { %1824 = vmatpush1.bf16.msra.mxu0 %v2500_v19 }
 0x726   : > { %v1728_v10 = vpop.xlane.xlu0 %1727 }
 0x727   : > { %v1729_v11 = vmul.f32 0.015625, %v1728_v10 }
 0x729   : > { %v1730_v12 = vsub.f32 %v3139_v7, %v1729_v11 }
 0x72b   : > { %v1731_v13 = vmul.f32 %v1730_v12, %v1730_v12 }
 0x72d   : > { %v1732_v14 = vsel %vm475_vm0, %v1731_v13, 0.0 }
 0x72e   : > { %1733 = vadd.xlane.f32.xlu1 %v1732_v14 }
 0x7bb   : > { %v1734_v28 = vpop.xlane.xlu1 %1733 }
 0x7bc   : > { %v1735_v32 = vmul.f32 0.015625, %v1734_v28 }
 0x7be   : > { %v1736_v33 = vadd.f32 1e-05, %v1735_v32 }
 0x7c0   : > { %2553 = vrsqrt.f32 %v1736_v33 }
 0x7ca   : > { %v2554_v34 = vpop.eup %2553 }
 0x7cb   : > { %v1738_v36 = vmul.f32 %v2554_v34, %v1730_v12 }
 0x7cd   : > { %v1745_v38 = vmul.f32 %v2198_v35, %v1738_v36 }
 0x7cf   : > { %v1752_v39 = vadd.f32 %v2199_v37, %v1745_v38 }
 0x7d1   : > { %v1753_v40 = vpack.c.bf16 %v1752_v39, %v1752_v39 }
 0x7d3   : > { %2208 = vmatmul.mubr.msk.bf16.vlgmr.msra.gmra.mrb[44].mxu0 %vm475_vm0, %v1753_v40 }
 0x8a6   : > { %v1851_v52 = vpop.f32.mrb[44].mxu0 }
 0x8a7   : > { %v1852_v53 = vadd.f32 %v1851_v52, %v1767_v49  ;;  %v1853_v54 = vpop.f32.mrb[45].mxu0 }
 0x8a8   : > { %v1854_v55 = vadd.f32 %v1853_v54, %v1771_v51  ;;  %v1855_v56 = vpop.f32.mrb[46].mxu0 }
 0x8a9   : > { %v1858_v57 = vmax.f32 %v1852_v53, 0.0  ;;  %v1856_v58 = vpop.f32.mrb[47].mxu0 }
 0x8aa   : > { %v1859_v59 = vmax.f32 %v1854_v55, 0.0 }
 0x8ab   : > { %v1860_v61 = vpack.c.bf16 %v1858_v57, %v1858_v57 }
 0x8ac   : > { %v1861_v60 = vpack.c.bf16 %v1859_v59, %v1859_v59 }
 0x8ae   : > { %2029 = vmatprep.mubr.bf16.mxu1 %v1861_v60 }
 0x8af   : > { %2030 = vmatmul.mubr.bf16.vlgmr.msra.gmra.mrb[36].mxu1 %v1860_v61 }
 0x982   : > { %v2278_v62 = vpop.f32.mrb[36].mxu1 }
 0x983   : > { %v2279_v4 = vpop.f32.mrb[37].mxu1 }
 0x984   : > { %v2280_v5 = vadd.f32 %v2279_v4, %v2278_v62  ;;  %v2281_v2 = vpop.f32.mrb[38].mxu1 }
 0x985   : > { %v2282_v6 = vpop.f32.mrb[39].mxu1 }
 0x986   : > { %v2032_v8 = vadd.f32 %v2280_v5, %v2209_v1 }
 0x988   : > { %v2037_v10 = vadd.f32 %v2032_v8, %v3139_v7 }
 0x98a   : > { %2038 = vst.msk [vmem:[%s470_s22] sm:$0xff] %vm475_vm0, %v2037_v10 }
 0x98b   : > { %2626 = shalt.err (!%p2623_p7)
}
 0x98c   : > { %s2627_s13 = scalar_lea.hbm %s3237_s12, 128  ;;  %s2631_s21 = scalar_lea.hbm %s3323_s10, 256 }
 0x98d   : > { %p2628_p9 = scmp.ne.s32.totalorder %s3237_s12, %s2627_s13  ;;  %p2632_p0 = scmp.lt.u32.totalorder %s3237_s12, %s3323_s10 }
 0x98e   : > { %p2633_p11 = scmp.lt.u32.totalorder %s2631_s21, %s2627_s13  ;;  %p2635_p4 = scmp.lt.u32.totalorder %s2627_s13, %s3237_s12 }
 0x98f   : > { %p2629_p2 = pnand %p2628_p9, %p2855_p12 }
 0x990   : > { %p2634_p1 = por %p2633_p11, %p2632_p0 }
 0x991   : > { %p2630_p5 = pneg %p2629_p2 }
 0x992   : > { %p2636_p6 = por %p2635_p4, %p2634_p1 }
 0x994   : > { %p2637_p8 = pnand %p2636_p6, %p2630_p5 }
 0x996   : > { %2640 = shalt.err (!%p2637_p8)
}
 0x997   : > { %2386 = dma.vmem_to_hbm [thread:$0]  (%p2855_p12), %s3239_s15, 128, %s3237_s12, %s2040_s17  }
 0x998 PF: > { %s3324_s18 = sld [smem:[#allocation11_spill]]  ;;  %s3325_s29 = sld [smem:[#allocation12_spill]] }
 0x999   : > { %p3327_p13 = scmp.ge.s32.totalorder %s2683_s28, 2 }
 0x99e   : > { %s2065_s23 = sand.u32 1, %s3324_s18   ;;  %p3326_p10 = scmp.ne.s32.totalorder %s3325_s29, 0 }
 0x99f   : > { %s2066_s19 = scalar_lea.sflag [#allocation4], %s2065_s23 }
 0x9a0   : > { %p2397_p3 = pnand %p3327_p13, %p3326_p10 }
 0x9a2   : > { %2666 = dma.done.wait (!%p2397_p3), %s2066_s19, 128  }
 0x9a3   : > { %2668 = vsyncadd (!%p2397_p3), %s2066_s19, 4294967168  ;;  %s3328_s28 = sld [smem:[#allocation13_spill]]  ;;  %s3329_s25 = smov %s2675_s26 }
 0x9a4   : > { %s3330_s26 = smov %s2679_s27  ;;  %s3331_s27 = smov %s2851_s20 }
 0x9a9   : > { %p27_p7 = scmp.ge.s32.totalorder %s3328_s28, 4  }
 0x9ab   :  { %29 = sbr.rel (!%p27_p7) target bundleno = 10 (0xa), region = 121 }
 0x9b2   :  { %2071 = vsyncpa [#allocation3], 1 }
 0x9b3   :  { %2073 = vsyncpa [#allocation3 + $0x1], 1 }
 0x9b4   :  { %2074 = vsyncpa [#allocation6], 1 }
 0x9b5   :  { %2075 = vsyncpa [#allocation4], 1 }
 0x9b6   :  { %2077 = vsyncpa [#allocation4 + $0x1], 1 }

</bundles_post_ra>
